<compile_context>
chip_gen: v5e
topology: v5e:2x2
jax: 0.10.0
libtpu: 0.0.40
codegen_flags: <defaults>
</compile_context>

<pallas_src>
import functools

import jax
import jax.numpy as jnp
from jax import lax
from jax.experimental import pallas as pl
from jax.experimental.pallas import tpu as pltpu


def _full_spec(shape):
    return pl.BlockSpec(shape, lambda *_: (0,) * len(shape))


# ----------------------------------------------------------------------------
# Fused transformer encoder: one pallas_call, grid = (num_layers,)
# ----------------------------------------------------------------------------

def _encoder_layer_kernel(bias_ref, h_ref,
                          ln1g_ref, ln1b_ref, wqkv_ref, bqkv_ref, wo_ref, bo_ref,
                          ln2g_ref, ln2b_ref, w1_ref, b1_ref, w2_ref, b2_ref,
                          o_ref, *, num_heads, eps):
    layer = pl.program_id(0)

    # Initialize the VMEM-resident state from the embeddings at the first layer.
    # TODO(synk): Pallas does not preload revisited output blocks from HBM, so
    # input_output_aliases alone cannot remove this init copy; h0 is only
    # fetched once (constant index_map) and stays resident.
    @pl.when(layer == 0)
    def _():
        o_ref[...] = h_ref[...]

    B, S, D = o_ref.shape
    H = num_heads
    Dh = D // H
    scale = 1.0 / (Dh ** 0.5)

    x = o_ref[...].reshape(B * S, D)                 # f32 residual stream
    bias = bias_ref[...]                             # [B, 1, S] additive key-mask bias

    def layer_norm(t, g_row, b_row):
        # BERT-pytorch LayerNorm: unbiased std (d-1), normalize by (std + eps).
        d = t.shape[-1]
        mean = jnp.mean(t, axis=-1, keepdims=True)
        diff = t - mean
        var = jnp.sum(diff * diff, axis=-1, keepdims=True) * (1.0 / (d - 1))
        return g_row * diff / (jnp.sqrt(var) + eps) + b_row

    # ---- attention sublayer: x + Wo(MHA(LN1(x))) + bo ------------------------
    xn = layer_norm(x, ln1g_ref[0], ln1b_ref[0])
    qkv = jnp.dot(xn.astype(jnp.bfloat16), wqkv_ref[0],
                  preferred_element_type=jnp.float32) + bqkv_ref[0]
    ctx_heads = []
    # TODO(synk): for real BERT shapes, tile tokens with a "parallel" grid axis
    # (flash-style attention) and process heads in 128-lane groups; at toy
    # sizes the static per-head loop is fine.
    for hh in range(H):
        lo = hh * Dh
        q = qkv[:, lo:lo + Dh].reshape(B, S, Dh).astype(jnp.bfloat16)
        k = qkv[:, D + lo:D + lo + Dh].reshape(B, S, Dh).astype(jnp.bfloat16)
        v = qkv[:, 2 * D + lo:2 * D + lo + Dh].reshape(B, S, Dh).astype(jnp.bfloat16)
        s = jnp.einsum('bqd,bkd->bqk', q, k,
                       preferred_element_type=jnp.float32) * scale + bias
        s = s - jnp.max(s, axis=-1, keepdims=True)
        p = jnp.exp(s)
        p = p * pl.reciprocal(jnp.sum(p, axis=-1, keepdims=True), approx=True)
        ctx_heads.append(jnp.einsum('bqk,bkd->bqd', p.astype(jnp.bfloat16), v,
                                    preferred_element_type=jnp.float32))
    # Single output projection over the concatenated head contexts.
    ctx = jnp.concatenate(ctx_heads, axis=-1).reshape(B * S, D)
    attn = jnp.dot(ctx.astype(jnp.bfloat16), wo_ref[0],
                   preferred_element_type=jnp.float32) + bo_ref[0]
    x = x + attn

    # ---- feed-forward sublayer: x + W2(GELU(W1(LN2(x)))) ---------------------
    xn = layer_norm(x, ln2g_ref[0], ln2b_ref[0])
    hdn = jnp.dot(xn.astype(jnp.bfloat16), w1_ref[0],
                  preferred_element_type=jnp.float32) + b1_ref[0]
    hdn = 0.5 * hdn * (1.0 + jnp.tanh(0.7978845608028654 *
                                      (hdn + 0.044715 * hdn * hdn * hdn)))
    out = jnp.dot(hdn.astype(jnp.bfloat16), w2_ref[0],
                  preferred_element_type=jnp.float32) + b2_ref[0]
    x = x + out

    o_ref[...] = x.reshape(B, S, D)


def bert_encoder(h0, mask_bias, stk, num_heads, eps=1e-6):
    B, S, D = h0.shape
    L = stk["wqkv"].shape[0]
    D4 = stk["w1"].shape[2]

    def fixed(shape):
        return pl.BlockSpec(shape, lambda l: (0,) * len(shape))

    def per_layer(shape):
        return pl.BlockSpec((1,) + shape, lambda l: (l,) + (0,) * len(shape))

    # TODO(synk): for real BERT shapes, add a parallel token-tile grid axis,
    # split attention vs FFN weight residency, and re-derive tiles against
    # v7x's 64 MiB VMEM.
    return pl.pallas_call(
        functools.partial(_encoder_layer_kernel, num_heads=num_heads, eps=eps),
        out_shape=jax.ShapeDtypeStruct((B, S, D), jnp.float32),
        grid=(L,),
        in_specs=[
            fixed((B, 1, S)),                               # additive key-mask bias
            fixed((B, S, D)),                               # embeddings
            per_layer((1, D)), per_layer((1, D)),           # ln1 gamma / beta
            per_layer((D, 3 * D)), per_layer((1, 3 * D)),   # fused QKV (bf16 w)
            per_layer((D, D)), per_layer((1, D)),           # out proj   (bf16 w)
            per_layer((1, D)), per_layer((1, D)),           # ln2 gamma / beta
            per_layer((D, D4)), per_layer((1, D4)),         # ffn w1 / b1 (bf16 w)
            per_layer((D4, D)), per_layer((1, D)),          # ffn w2 / b2 (bf16 w)
        ],
        out_specs=fixed((B, S, D)),
        compiler_params=pltpu.CompilerParams(
            dimension_semantics=("arbitrary",),             # layer axis carries state
            vmem_limit_bytes=64 * 1024 * 1024),
    )(mask_bias, h0,
      stk["ln1_g"], stk["ln1_b"], stk["wqkv"], stk["bqkv"],
      stk["wo"], stk["bo"], stk["ln2_g"], stk["ln2_b"],
      stk["w1"], stk["b1"], stk["w2"], stk["b2"])


# ----------------------------------------------------------------------------
# Fused CTC head + loss: one pallas_call (linear + log_softmax + alpha DP)
# ----------------------------------------------------------------------------

def _ctc_kernel(h_ref, w_ref, b_ref, ext_ref, allow2_ref, valid_ref,
                ilens_ref, olens_ref, loss_ref, *lp_refs, batch, t_len, neg):
    B, T = batch, t_len
    V = w_ref.shape[1]
    Smax = ext_ref.shape[1]

    # CTC head: bf16 linear -> exact f32 log_softmax on the [B*T, V] slab.
    # TODO(synk): for real vocab sizes, tile V with an online logsumexp and
    # fuse the label gather into the vocab loop instead of one [B*T,V] slab.
    logits = jnp.dot(h_ref[...], w_ref[...],
                     preferred_element_type=jnp.float32) + b_ref[...]
    mx = jnp.max(logits, axis=-1, keepdims=True)
    z = logits - mx
    logp = z - jnp.log(jnp.sum(jnp.exp(z), axis=-1, keepdims=True))   # [B*T, V]

    # One-time label gather (one-hot NT matmul per batch), stored to VMEM
    # scratch so the serial DP only does vector loads.
    v_io = lax.broadcasted_iota(jnp.int32, (Smax, V), 1)
    for bb in range(B):
        logp_b = logp[bb * T:(bb + 1) * T, :]                          # [T, V]
        onehot_b = (ext_ref[bb] == v_io).astype(jnp.float32)           # [Smax, V]
        lp_refs[bb][...] = jnp.einsum('tv,sv->ts', logp_b, onehot_b,
                                      preferred_element_type=jnp.float32)

    s_io = lax.broadcasted_iota(jnp.int32, (B, Smax), 1)
    allow2 = allow2_ref[...]                                           # [B, Smax]
    valid = valid_ref[...]                                             # [B, Smax]
    ilens = ilens_ref[...]                                             # [B, 1]
    olens = olens_ref[...]                                             # [B, 1]
    neg2 = jnp.full((B, 2), neg, jnp.float32)

    # alpha is carried NEG-padded by 2 lanes: shift-by-1/2 are plain lane slices
    # (no MXU / roll on the latency-bound critical path).
    lp0 = jnp.concatenate([lp_refs[bb][0:1, :] for bb in range(B)], axis=0)
    alpha0 = jnp.where(s_io == 0, lp0, neg)
    alpha0 = jnp.where((s_io == 1) & (olens > 0), lp0, alpha0)
    carry0 = jnp.concatenate([neg2, alpha0], axis=1)                   # [B, Smax+2]

    def step(t, ap):
        lp_t = jnp.concatenate(
            [lp_refs[bb][pl.ds(t, 1), :] for bb in range(B)], axis=0)  # [B, Smax]
        a0 = ap[:, 2:]
        a1 = ap[:, 1:Smax + 1]
        a2 = ap[:, 0:Smax] + allow2
        m = jnp.maximum(jnp.maximum(a0, a1), a2)
        lse = m + jnp.log(jnp.exp(a0 - m) + jnp.exp(a1 - m) + jnp.exp(a2 - m))
        new = lse + lp_t + valid
        new = jnp.where(t < ilens, new, a0)                # freeze past ilen
        return jnp.concatenate([neg2, new], axis=1)

    ap = lax.fori_loop(1, T, step, carry0)
    alpha = ap[:, 2:]                                                  # [B, Smax]

    end = 2 * olens
    end_mask = (s_io == end) | ((s_io == end - 1) & (olens > 0))
    a_m = alpha + jnp.where(end_mask, 0.0, neg)
    m = jnp.max(a_m, axis=-1, keepdims=True)
    ll = m + jnp.log(jnp.sum(jnp.exp(a_m - m), axis=-1, keepdims=True))  # [B, 1]

    # torch.nn.CTCLoss(reduction='sum') divided by batch size (espnet builtin CTC)
    loss_ref[...] = jnp.sum(ll, keepdims=True) * (-1.0 / B)


def ctc_loss_pallas(h, w, b, ilens, ys, olens, blank=0):
    B, T, D = h.shape
    V = w.shape[1]
    U = ys.shape[1]
    Smax = 2 * U + 1
    NEG = -1e30

    # Extended label sequence + transition masks (tiny [B, Smax] arrays, plain JAX).
    u_idx = jnp.arange(U)
    ys_safe = jnp.where(u_idx[None, :] < olens[:, None], ys, blank)
    s_idx = jnp.arange(Smax)
    lab_pos = jnp.clip((s_idx - 1) // 2, 0, U - 1)
    ext = jnp.where(
        s_idx[None, :] % 2 == 1,
        jnp.take_along_axis(ys_safe, jnp.broadcast_to(lab_pos[None, :], (B, Smax)), axis=1),
        blank)
    valid_s = s_idx[None, :] < (2 * olens[:, None] + 1)
    ext = jnp.where(valid_s, ext, blank)
    ext_m2 = jnp.concatenate(
        [jnp.full((B, 2), blank, dtype=ext.dtype), ext[:, :-2]], axis=1)
    allow2 = (s_idx[None, :] >= 2) & (ext != blank) & (ext != ext_m2)
    allow2f = jnp.where(allow2, 0.0, NEG).astype(jnp.float32)
    valid_f = jnp.where(valid_s, 0.0, NEG).astype(jnp.float32)

    h2d = h.reshape(B * T, D).astype(jnp.bfloat16)         # bf16 activations for MXU
    ext3 = ext.astype(jnp.int32)[:, :, None]               # [B, Smax, 1]
    ilens2 = ilens.astype(jnp.int32)[:, None]              # [B, 1]
    olens2 = olens.astype(jnp.int32)[:, None]              # [B, 1]

    loss = pl.pallas_call(
        functools.partial(_ctc_kernel, batch=B, t_len=T, neg=NEG),
        out_shape=jax.ShapeDtypeStruct((1, 1), jnp.float32),
        grid=(1,),
        in_specs=[_full_spec((B * T, D)), _full_spec((D, V)), _full_spec((1, V)),
                  _full_spec((B, Smax, 1)), _full_spec((B, Smax)), _full_spec((B, Smax)),
                  _full_spec((B, 1)), _full_spec((B, 1))],
        out_specs=_full_spec((1, 1)),
        scratch_shapes=[pltpu.VMEM((T, Smax), jnp.float32) for _ in range(B)],
        compiler_params=pltpu.CompilerParams(
            dimension_semantics=("arbitrary",),
            vmem_limit_bytes=32 * 1024 * 1024),
    )(h2d, w, b.reshape(1, V), ext3, allow2f, valid_f, ilens2, olens2)
    return loss[0, 0]


# ----------------------------------------------------------------------------
# BERT_CTC forward
# ----------------------------------------------------------------------------

def bert_ctc_forward(params, x_ids, y, ilens, olens, num_heads):
    B, S = x_ids.shape

    # BERTEmbedding: token (padding_idx=0) + sinusoidal position; segment 0 == 0.
    # TODO(synk): the token-embedding gather stays in XLA (a Pallas DMA gather
    # adds nothing at these sizes).
    h0 = jnp.take(params["tok_emb"], x_ids, axis=0) + params["pos_emb"][None, :S, :]

    # Additive key-mask bias [B, 1, S] — broadcast over heads/query positions
    # inside the kernel (replaces per-head compare+select).
    mask_bias = jnp.where(x_ids > 0, 0.0, -1e9).astype(jnp.float32)[:, None, :]

    h = bert_encoder(h0, mask_bias, params["stacked"], num_heads)     # [B, S, D] f32
    return ctc_loss_pallas(h, params["ctc_w"], params["ctc_b"], ilens, y, olens)


# ----------------------------------------------------------------------------
# Deterministic parameter initialization (matmul weights stored pre-transposed
# [in, out] in bf16, stacked over layers for the single-encoder-kernel grid).
# ----------------------------------------------------------------------------

def sinusoidal_pos_emb(max_len, d):
    pos = jnp.arange(max_len, dtype=jnp.float32)[:, None]
    div = jnp.exp(jnp.arange(0, d, 2, dtype=jnp.float32) * -(jnp.log(10000.0) / d))
    pe = jnp.zeros((max_len, d), jnp.float32)
    pe = pe.at[:, 0::2].set(jnp.sin(pos * div))
    pe = pe.at[:, 1::2].set(jnp.cos(pos * div))
    return pe


def init_params(key, vocab, hidden, n_layers, max_len):
    D = hidden

    def nrm(k, shape, scale=0.05, dtype=jnp.float32):
        return (scale * jax.random.normal(k, shape, dtype=jnp.float32)).astype(dtype)

    ks = jax.random.split(key, 6)
    tok = nrm(ks[0], (vocab, D)).at[0].set(0.0)            # padding_idx = 0
    bf = jnp.bfloat16
    stacked = {
        "ln1_g": jnp.ones((n_layers, 1, D), jnp.float32),
        "ln1_b": jnp.zeros((n_layers, 1, D), jnp.float32),
        "wqkv": nrm(ks[1], (n_layers, D, 3 * D), dtype=bf),
        "bqkv": jnp.zeros((n_layers, 1, 3 * D), jnp.float32),
        "wo": nrm(ks[2], (n_layers, D, D), dtype=bf),
        "bo": jnp.zeros((n_layers, 1, D), jnp.float32),
        "ln2_g": jnp.ones((n_layers, 1, D), jnp.float32),
        "ln2_b": jnp.zeros((n_layers, 1, D), jnp.float32),
        "w1": nrm(ks[3], (n_layers, D, 4 * D), dtype=bf),
        "b1": jnp.zeros((n_layers, 1, 4 * D), jnp.float32),
        "w2": nrm(ks[4], (n_layers, 4 * D, D), dtype=bf),
        "b2": jnp.zeros((n_layers, 1, D), jnp.float32),
    }
    return {
        "tok_emb": tok,
        "pos_emb": sinusoidal_pos_emb(max_len, D),
        "stacked": stacked,
        "ctc_w": nrm(ks[5], (D, vocab), dtype=bf),
        "ctc_b": jnp.zeros((vocab,), jnp.float32),
    }


# ----------------------------------------------------------------------------
# Main
# ----------------------------------------------------------------------------

if __name__ == "__main__":
    B, S, VOCAB, HIDDEN, HEADS, LAYERS, UMAX = 2, 16, 36, 32, 4, 2, 5

    key = jax.random.PRNGKey(0)
    k_p, k_x, k_y = jax.random.split(key, 3)

    params = init_params(k_p, VOCAB, HIDDEN, LAYERS, max_len=S)

    ilens = jnp.array([16, 12], dtype=jnp.int32)
    olens = jnp.array([5, 4], dtype=jnp.int32)

    x = jax.random.randint(k_x, (B, S), 1, VOCAB, dtype=jnp.int32)
    x = jnp.where(jnp.arange(S)[None, :] < ilens[:, None], x, 0)       # 0 = pad token

    y = jax.random.randint(k_y, (B, UMAX), 1, VOCAB, dtype=jnp.int32)
    y = jnp.where(jnp.arange(UMAX)[None, :] < olens[:, None], y, -1)   # -1 = ignore

    forward = jax.jit(bert_ctc_forward, static_argnums=(5,))
    loss = forward(params, x, y, ilens, olens, HEADS)
    loss = jax.block_until_ready(loss)

    assert loss.shape == () and bool(jnp.isfinite(loss)), f"bad loss: {loss}"
    print("KERNEL_OK")
</pallas_src>

<mosaic_0001>
module attributes {stable_mosaic.version = 11 : i64} {
  func.func @_encoder_layer_kernel(%arg0: i32, %arg1: memref<2x1x16xf32, #tpu.memory_space<vmem>>, %arg2: memref<2x16x32xf32, #tpu.memory_space<vmem>>, %arg3: memref<1x1x32xf32, #tpu.memory_space<vmem>>, %arg4: memref<1x1x32xf32, #tpu.memory_space<vmem>>, %arg5: memref<1x32x96xbf16, #tpu.memory_space<vmem>>, %arg6: memref<1x1x96xf32, #tpu.memory_space<vmem>>, %arg7: memref<1x32x32xbf16, #tpu.memory_space<vmem>>, %arg8: memref<1x1x32xf32, #tpu.memory_space<vmem>>, %arg9: memref<1x1x32xf32, #tpu.memory_space<vmem>>, %arg10: memref<1x1x32xf32, #tpu.memory_space<vmem>>, %arg11: memref<1x32x128xbf16, #tpu.memory_space<vmem>>, %arg12: memref<1x1x128xf32, #tpu.memory_space<vmem>>, %arg13: memref<1x128x32xbf16, #tpu.memory_space<vmem>>, %arg14: memref<1x1x32xf32, #tpu.memory_space<vmem>>, %arg15: memref<2x16x32xf32, #tpu.memory_space<vmem>>) attributes {dimension_semantics = [#tpu.dimension_semantics<arbitrary>], iteration_bounds = array<i64: 2>, scalar_prefetch = 0 : i64, scratch_operands = 0 : i64, tpu.core_type = #tpu.core_type<tc>, window_params = [{pipeline_mode = #tpu.pipeline_mode<synchronous>, transform_indices = @transform_0, window_bounds = array<i64: 2, 1, 16>}, {pipeline_mode = #tpu.pipeline_mode<synchronous>, transform_indices = @transform_1, window_bounds = array<i64: 2, 16, 32>}, {transform_indices = @transform_2, window_bounds = array<i64: 1, 1, 32>}, {transform_indices = @transform_3, window_bounds = array<i64: 1, 1, 32>}, {transform_indices = @transform_4, window_bounds = array<i64: 1, 32, 96>}, {transform_indices = @transform_5, window_bounds = array<i64: 1, 1, 96>}, {transform_indices = @transform_6, window_bounds = array<i64: 1, 32, 32>}, {transform_indices = @transform_7, window_bounds = array<i64: 1, 1, 32>}, {transform_indices = @transform_8, window_bounds = array<i64: 1, 1, 32>}, {transform_indices = @transform_9, window_bounds = array<i64: 1, 1, 32>}, {transform_indices = @transform_10, window_bounds = array<i64: 1, 32, 128>}, {transform_indices = @transform_11, window_bounds = array<i64: 1, 1, 128>}, {transform_indices = @transform_12, window_bounds = array<i64: 1, 128, 32>}, {transform_indices = @transform_13, window_bounds = array<i64: 1, 1, 32>}, {pipeline_mode = #tpu.pipeline_mode<synchronous>, transform_indices = @transform_14, window_bounds = array<i64: 2, 16, 32>}]} {
    %c0_i32 = arith.constant 0 : i32
    %0 = arith.cmpi eq, %arg0, %c0_i32 : i32
    %1 = arith.extui %0 : i1 to i32
    %c0_i32_0 = arith.constant 0 : i32
    %2 = arith.cmpi ne, %1, %c0_i32_0 : i32
    scf.if %2 {
      %c0_82 = arith.constant 0 : index
      %c0_83 = arith.constant 0 : index
      %c0_84 = arith.constant 0 : index
      %209 = vector.load %arg2[%c0_82, %c0_83, %c0_84] : memref<2x16x32xf32, #tpu.memory_space<vmem>>, vector<2x16x32xf32>
      %c0_85 = arith.constant 0 : index
      %c0_86 = arith.constant 0 : index
      %c0_87 = arith.constant 0 : index
      %210 = vector.load %arg15[%c0_85, %c0_86, %c0_87] : memref<2x16x32xf32, #tpu.memory_space<vmem>>, vector<2x16x32xf32>
      tpu.vector_store %arg15[%c0_85, %c0_86, %c0_87], %209 {strides = array<i32>} : memref<2x16x32xf32, #tpu.memory_space<vmem>>, vector<2x16x32xf32>,
    } else {
    }
    %c0 = arith.constant 0 : index
    %c0_1 = arith.constant 0 : index
    %c0_2 = arith.constant 0 : index
    %3 = vector.load %arg15[%c0, %c0_1, %c0_2] : memref<2x16x32xf32, #tpu.memory_space<vmem>>, vector<2x16x32xf32>
    %4 = vector.shape_cast %3 : vector<2x16x32xf32> to vector<32x32xf32>
    %c0_3 = arith.constant 0 : index
    %c0_4 = arith.constant 0 : index
    %c0_5 = arith.constant 0 : index
    %5 = vector.load %arg1[%c0_3, %c0_4, %c0_5] : memref<2x1x16xf32, #tpu.memory_space<vmem>>, vector<2x1x16xf32>
    %c0_6 = arith.constant 0 : index
    %c0_7 = arith.constant 0 : index
    %c0_8 = arith.constant 0 : index
    %6 = vector.load %arg3[%c0_6, %c0_7, %c0_8] : memref<1x1x32xf32, #tpu.memory_space<vmem>>, vector<1x1x32xf32>
    %7 = vector.shape_cast %6 : vector<1x1x32xf32> to vector<1x32xf32>
    %c0_9 = arith.constant 0 : index
    %c0_10 = arith.constant 0 : index
    %c0_11 = arith.constant 0 : index
    %8 = vector.load %arg4[%c0_9, %c0_10, %c0_11] : memref<1x1x32xf32, #tpu.memory_space<vmem>>, vector<1x1x32xf32>
    %9 = vector.shape_cast %8 : vector<1x1x32xf32> to vector<1x32xf32>
    %cst = arith.constant dense<0.000000e+00> : vector<32xf32>
    %10 = vector.multi_reduction <add>, %4, %cst [1] : vector<32x32xf32> to vector<32xf32>
    %11 = vector.shape_cast %10 : vector<32xf32> to vector<32x1xf32>
    %cst_12 = arith.constant 3.200000e+01 : f32
    %12 = vector.broadcast %cst_12 : f32 to vector<32x1xf32>
    %13 = arith.divf %11, %12 : vector<32x1xf32>
    %14 = vector.broadcast %13 : vector<32x1xf32> to vector<32x32xf32>
    %15 = arith.subf %4, %14 : vector<32x32xf32>
    %16 = arith.mulf %15, %15 : vector<32x32xf32>
    %cst_13 = arith.constant dense<0.000000e+00> : vector<32xf32>
    %17 = vector.multi_reduction <add>, %16, %cst_13 [1] : vector<32x32xf32> to vector<32xf32>
    %18 = vector.shape_cast %17 : vector<32xf32> to vector<32x1xf32>
    %cst_14 = arith.constant 0.0322580636 : f32
    %19 = vector.broadcast %cst_14 : f32 to vector<32x1xf32>
    %20 = arith.mulf %18, %19 : vector<32x1xf32>
    %21 = vector.broadcast %7 : vector<1x32xf32> to vector<32x32xf32>
    %22 = arith.mulf %21, %15 : vector<32x32xf32>
    %23 = math.sqrt %20 : vector<32x1xf32>
    %cst_15 = arith.constant 9.99999997E-7 : f32
    %24 = vector.broadcast %cst_15 : f32 to vector<32x1xf32>
    %25 = arith.addf %23, %24 : vector<32x1xf32>
    %26 = vector.broadcast %25 : vector<32x1xf32> to vector<32x32xf32>
    %27 = arith.divf %22, %26 : vector<32x32xf32>
    %28 = vector.broadcast %9 : vector<1x32xf32> to vector<32x32xf32>
    %29 = arith.addf %27, %28 : vector<32x32xf32>
    %30 = arith.truncf %29 : vector<32x32xf32> to vector<32x32xbf16>
    %c0_16 = arith.constant 0 : index
    %c0_17 = arith.constant 0 : index
    %c0_18 = arith.constant 0 : index
    %31 = vector.load %arg5[%c0_16, %c0_17, %c0_18] : memref<1x32x96xbf16, #tpu.memory_space<vmem>>, vector<1x32x96xbf16>
    %32 = vector.shape_cast %31 : vector<1x32x96xbf16> to vector<32x96xbf16>
    %cst_19 = arith.constant dense<0.000000e+00> : vector<32x96xf32>
    %33 = tpu.matmul %30, %32, %cst_19 {dimension_numbers = #tpu.dot_dimension_numbers<[1], [0], [0], [1], [0, 0, 1, 1], [], []>} : vector<32x32xbf16>, vector<32x96xbf16>, vector<32x96xf32> -> vector<32x96xf32>
    %c0_20 = arith.constant 0 : index
    %c0_21 = arith.constant 0 : index
    %c0_22 = arith.constant 0 : index
    %34 = vector.load %arg6[%c0_20, %c0_21, %c0_22] : memref<1x1x96xf32, #tpu.memory_space<vmem>>, vector<1x1x96xf32>
    %35 = vector.shape_cast %34 : vector<1x1x96xf32> to vector<1x96xf32>
    %36 = vector.broadcast %35 : vector<1x96xf32> to vector<32x96xf32>
    %37 = arith.addf %33, %36 : vector<32x96xf32>
    %38 = vector.extract_strided_slice %37 {offsets = [0, 0], sizes = [32, 8], strides = [1, 1]} : vector<32x96xf32> to vector<32x8xf32>
    %39 = vector.shape_cast %38 : vector<32x8xf32> to vector<2x16x8xf32>
    %40 = arith.truncf %39 : vector<2x16x8xf32> to vector<2x16x8xbf16>
    %41 = vector.extract_strided_slice %37 {offsets = [0, 32], sizes = [32, 8], strides = [1, 1]} : vector<32x96xf32> to vector<32x8xf32>
    %42 = vector.shape_cast %41 : vector<32x8xf32> to vector<2x16x8xf32>
    %43 = arith.truncf %42 : vector<2x16x8xf32> to vector<2x16x8xbf16>
    %44 = vector.extract_strided_slice %37 {offsets = [0, 64], sizes = [32, 8], strides = [1, 1]} : vector<32x96xf32> to vector<32x8xf32>
    %45 = vector.shape_cast %44 : vector<32x8xf32> to vector<2x16x8xf32>
    %46 = arith.truncf %45 : vector<2x16x8xf32> to vector<2x16x8xbf16>
    "tpu.trace_start"() <{level = 10 : i32, message = "bqd,bkd->bqk"}> : () -> ()
    %cst_23 = arith.constant dense<0.000000e+00> : vector<2x16x16xf32>
    %47 = tpu.matmul %40, %43, %cst_23 {dimension_numbers = #tpu.dot_dimension_numbers<[2], [2], [1], [1], [0, 0, 0, 1, 1, 1], [0], [0]>} : vector<2x16x8xbf16>, vector<2x16x8xbf16>, vector<2x16x16xf32> -> vector<2x16x16xf32>
    "tpu.trace_stop"() : () -> ()
    %cst_24 = arith.constant 0.353553385 : f32
    %48 = vector.broadcast %cst_24 : f32 to vector<2x16x16xf32>
    %49 = arith.mulf %47, %48 : vector<2x16x16xf32>
    %50 = vector.broadcast %5 : vector<2x1x16xf32> to vector<2x16x16xf32>
    %51 = arith.addf %49, %50 : vector<2x16x16xf32>
    %cst_25 = arith.constant dense<0xFF800000> : vector<2x16xf32>
    %52 = vector.multi_reduction <maximumf>, %51, %cst_25 [2] : vector<2x16x16xf32> to vector<2x16xf32>
    %53 = vector.shape_cast %52 : vector<2x16xf32> to vector<2x16x1xf32>
    %54 = vector.broadcast %53 : vector<2x16x1xf32> to vector<2x16x16xf32>
    %55 = arith.subf %51, %54 : vector<2x16x16xf32>
    %56 = math.exp %55 : vector<2x16x16xf32>
    %cst_26 = arith.constant dense<0.000000e+00> : vector<2x16xf32>
    %57 = vector.multi_reduction <add>, %56, %cst_26 [2] : vector<2x16x16xf32> to vector<2x16xf32>
    %58 = vector.shape_cast %57 : vector<2x16xf32> to vector<2x16x1xf32>
    %59 = tpu.reciprocal %58 {approx = true} : vector<2x16x1xf32> -> vector<2x16x1xf32>
    %60 = vector.broadcast %59 : vector<2x16x1xf32> to vector<2x16x16xf32>
    %61 = arith.mulf %56, %60 : vector<2x16x16xf32>
    %62 = arith.truncf %61 : vector<2x16x16xf32> to vector<2x16x16xbf16>
    "tpu.trace_start"() <{level = 10 : i32, message = "bqk,bkd->bqd"}> : () -> ()
    %cst_27 = arith.constant dense<0.000000e+00> : vector<2x16x8xf32>
    %63 = tpu.matmul %62, %46, %cst_27 {dimension_numbers = #tpu.dot_dimension_numbers<[2], [1], [1], [2], [0, 0, 0, 1, 1, 2], [0], [0]>} : vector<2x16x16xbf16>, vector<2x16x8xbf16>, vector<2x16x8xf32> -> vector<2x16x8xf32>
    "tpu.trace_stop"() : () -> ()
    %64 = vector.extract_strided_slice %37 {offsets = [0, 8], sizes = [32, 8], strides = [1, 1]} : vector<32x96xf32> to vector<32x8xf32>
    %65 = vector.shape_cast %64 : vector<32x8xf32> to vector<2x16x8xf32>
    %66 = arith.truncf %65 : vector<2x16x8xf32> to vector<2x16x8xbf16>
    %67 = vector.extract_strided_slice %37 {offsets = [0, 40], sizes = [32, 8], strides = [1, 1]} : vector<32x96xf32> to vector<32x8xf32>
    %68 = vector.shape_cast %67 : vector<32x8xf32> to vector<2x16x8xf32>
    %69 = arith.truncf %68 : vector<2x16x8xf32> to vector<2x16x8xbf16>
    %70 = vector.extract_strided_slice %37 {offsets = [0, 72], sizes = [32, 8], strides = [1, 1]} : vector<32x96xf32> to vector<32x8xf32>
    %71 = vector.shape_cast %70 : vector<32x8xf32> to vector<2x16x8xf32>
    %72 = arith.truncf %71 : vector<2x16x8xf32> to vector<2x16x8xbf16>
    "tpu.trace_start"() <{level = 10 : i32, message = "bqd,bkd->bqk"}> : () -> ()
    %cst_28 = arith.constant dense<0.000000e+00> : vector<2x16x16xf32>
    %73 = tpu.matmul %66, %69, %cst_28 {dimension_numbers = #tpu.dot_dimension_numbers<[2], [2], [1], [1], [0, 0, 0, 1, 1, 1], [0], [0]>} : vector<2x16x8xbf16>, vector<2x16x8xbf16>, vector<2x16x16xf32> -> vector<2x16x16xf32>
    "tpu.trace_stop"() : () -> ()
    %cst_29 = arith.constant 0.353553385 : f32
    %74 = vector.broadcast %cst_29 : f32 to vector<2x16x16xf32>
    %75 = arith.mulf %73, %74 : vector<2x16x16xf32>
    %76 = vector.broadcast %5 : vector<2x1x16xf32> to vector<2x16x16xf32>
    %77 = arith.addf %75, %76 : vector<2x16x16xf32>
    %cst_30 = arith.constant dense<0xFF800000> : vector<2x16xf32>
    %78 = vector.multi_reduction <maximumf>, %77, %cst_30 [2] : vector<2x16x16xf32> to vector<2x16xf32>
    %79 = vector.shape_cast %78 : vector<2x16xf32> to vector<2x16x1xf32>
    %80 = vector.broadcast %79 : vector<2x16x1xf32> to vector<2x16x16xf32>
    %81 = arith.subf %77, %80 : vector<2x16x16xf32>
    %82 = math.exp %81 : vector<2x16x16xf32>
    %cst_31 = arith.constant dense<0.000000e+00> : vector<2x16xf32>
    %83 = vector.multi_reduction <add>, %82, %cst_31 [2] : vector<2x16x16xf32> to vector<2x16xf32>
    %84 = vector.shape_cast %83 : vector<2x16xf32> to vector<2x16x1xf32>
    %85 = tpu.reciprocal %84 {approx = true} : vector<2x16x1xf32> -> vector<2x16x1xf32>
    %86 = vector.broadcast %85 : vector<2x16x1xf32> to vector<2x16x16xf32>
    %87 = arith.mulf %82, %86 : vector<2x16x16xf32>
    %88 = arith.truncf %87 : vector<2x16x16xf32> to vector<2x16x16xbf16>
    "tpu.trace_start"() <{level = 10 : i32, message = "bqk,bkd->bqd"}> : () -> ()
    %cst_32 = arith.constant dense<0.000000e+00> : vector<2x16x8xf32>
    %89 = tpu.matmul %88, %72, %cst_32 {dimension_numbers = #tpu.dot_dimension_numbers<[2], [1], [1], [2], [0, 0, 0, 1, 1, 2], [0], [0]>} : vector<2x16x16xbf16>, vector<2x16x8xbf16>, vector<2x16x8xf32> -> vector<2x16x8xf32>
    "tpu.trace_stop"() : () -> ()
    %90 = vector.extract_strided_slice %37 {offsets = [0, 16], sizes = [32, 8], strides = [1, 1]} : vector<32x96xf32> to vector<32x8xf32>
    %91 = vector.shape_cast %90 : vector<32x8xf32> to vector<2x16x8xf32>
    %92 = arith.truncf %91 : vector<2x16x8xf32> to vector<2x16x8xbf16>
    %93 = vector.extract_strided_slice %37 {offsets = [0, 48], sizes = [32, 8], strides = [1, 1]} : vector<32x96xf32> to vector<32x8xf32>
    %94 = vector.shape_cast %93 : vector<32x8xf32> to vector<2x16x8xf32>
    %95 = arith.truncf %94 : vector<2x16x8xf32> to vector<2x16x8xbf16>
    %96 = vector.extract_strided_slice %37 {offsets = [0, 80], sizes = [32, 8], strides = [1, 1]} : vector<32x96xf32> to vector<32x8xf32>
    %97 = vector.shape_cast %96 : vector<32x8xf32> to vector<2x16x8xf32>
    %98 = arith.truncf %97 : vector<2x16x8xf32> to vector<2x16x8xbf16>
    "tpu.trace_start"() <{level = 10 : i32, message = "bqd,bkd->bqk"}> : () -> ()
    %cst_33 = arith.constant dense<0.000000e+00> : vector<2x16x16xf32>
    %99 = tpu.matmul %92, %95, %cst_33 {dimension_numbers = #tpu.dot_dimension_numbers<[2], [2], [1], [1], [0, 0, 0, 1, 1, 1], [0], [0]>} : vector<2x16x8xbf16>, vector<2x16x8xbf16>, vector<2x16x16xf32> -> vector<2x16x16xf32>
    "tpu.trace_stop"() : () -> ()
    %cst_34 = arith.constant 0.353553385 : f32
    %100 = vector.broadcast %cst_34 : f32 to vector<2x16x16xf32>
    %101 = arith.mulf %99, %100 : vector<2x16x16xf32>
    %102 = vector.broadcast %5 : vector<2x1x16xf32> to vector<2x16x16xf32>
    %103 = arith.addf %101, %102 : vector<2x16x16xf32>
    %cst_35 = arith.constant dense<0xFF800000> : vector<2x16xf32>
    %104 = vector.multi_reduction <maximumf>, %103, %cst_35 [2] : vector<2x16x16xf32> to vector<2x16xf32>
    %105 = vector.shape_cast %104 : vector<2x16xf32> to vector<2x16x1xf32>
    %106 = vector.broadcast %105 : vector<2x16x1xf32> to vector<2x16x16xf32>
    %107 = arith.subf %103, %106 : vector<2x16x16xf32>
    %108 = math.exp %107 : vector<2x16x16xf32>
    %cst_36 = arith.constant dense<0.000000e+00> : vector<2x16xf32>
    %109 = vector.multi_reduction <add>, %108, %cst_36 [2] : vector<2x16x16xf32> to vector<2x16xf32>
    %110 = vector.shape_cast %109 : vector<2x16xf32> to vector<2x16x1xf32>
    %111 = tpu.reciprocal %110 {approx = true} : vector<2x16x1xf32> -> vector<2x16x1xf32>
    %112 = vector.broadcast %111 : vector<2x16x1xf32> to vector<2x16x16xf32>
    %113 = arith.mulf %108, %112 : vector<2x16x16xf32>
    %114 = arith.truncf %113 : vector<2x16x16xf32> to vector<2x16x16xbf16>
    "tpu.trace_start"() <{level = 10 : i32, message = "bqk,bkd->bqd"}> : () -> ()
    %cst_37 = arith.constant dense<0.000000e+00> : vector<2x16x8xf32>
    %115 = tpu.matmul %114, %98, %cst_37 {dimension_numbers = #tpu.dot_dimension_numbers<[2], [1], [1], [2], [0, 0, 0, 1, 1, 2], [0], [0]>} : vector<2x16x16xbf16>, vector<2x16x8xbf16>, vector<2x16x8xf32> -> vector<2x16x8xf32>
    "tpu.trace_stop"() : () -> ()
    %116 = vector.extract_strided_slice %37 {offsets = [0, 24], sizes = [32, 8], strides = [1, 1]} : vector<32x96xf32> to vector<32x8xf32>
    %117 = vector.shape_cast %116 : vector<32x8xf32> to vector<2x16x8xf32>
    %118 = arith.truncf %117 : vector<2x16x8xf32> to vector<2x16x8xbf16>
    %119 = vector.extract_strided_slice %37 {offsets = [0, 56], sizes = [32, 8], strides = [1, 1]} : vector<32x96xf32> to vector<32x8xf32>
    %120 = vector.shape_cast %119 : vector<32x8xf32> to vector<2x16x8xf32>
    %121 = arith.truncf %120 : vector<2x16x8xf32> to vector<2x16x8xbf16>
    %122 = vector.extract_strided_slice %37 {offsets = [0, 88], sizes = [32, 8], strides = [1, 1]} : vector<32x96xf32> to vector<32x8xf32>
    %123 = vector.shape_cast %122 : vector<32x8xf32> to vector<2x16x8xf32>
    %124 = arith.truncf %123 : vector<2x16x8xf32> to vector<2x16x8xbf16>
    "tpu.trace_start"() <{level = 10 : i32, message = "bqd,bkd->bqk"}> : () -> ()
    %cst_38 = arith.constant dense<0.000000e+00> : vector<2x16x16xf32>
    %125 = tpu.matmul %118, %121, %cst_38 {dimension_numbers = #tpu.dot_dimension_numbers<[2], [2], [1], [1], [0, 0, 0, 1, 1, 1], [0], [0]>} : vector<2x16x8xbf16>, vector<2x16x8xbf16>, vector<2x16x16xf32> -> vector<2x16x16xf32>
    "tpu.trace_stop"() : () -> ()
    %cst_39 = arith.constant 0.353553385 : f32
    %126 = vector.broadcast %cst_39 : f32 to vector<2x16x16xf32>
    %127 = arith.mulf %125, %126 : vector<2x16x16xf32>
    %128 = vector.broadcast %5 : vector<2x1x16xf32> to vector<2x16x16xf32>
    %129 = arith.addf %127, %128 : vector<2x16x16xf32>
    %cst_40 = arith.constant dense<0xFF800000> : vector<2x16xf32>
    %130 = vector.multi_reduction <maximumf>, %129, %cst_40 [2] : vector<2x16x16xf32> to vector<2x16xf32>
    %131 = vector.shape_cast %130 : vector<2x16xf32> to vector<2x16x1xf32>
    %132 = vector.broadcast %131 : vector<2x16x1xf32> to vector<2x16x16xf32>
    %133 = arith.subf %129, %132 : vector<2x16x16xf32>
    %134 = math.exp %133 : vector<2x16x16xf32>
    %cst_41 = arith.constant dense<0.000000e+00> : vector<2x16xf32>
    %135 = vector.multi_reduction <add>, %134, %cst_41 [2] : vector<2x16x16xf32> to vector<2x16xf32>
    %136 = vector.shape_cast %135 : vector<2x16xf32> to vector<2x16x1xf32>
    %137 = tpu.reciprocal %136 {approx = true} : vector<2x16x1xf32> -> vector<2x16x1xf32>
    %138 = vector.broadcast %137 : vector<2x16x1xf32> to vector<2x16x16xf32>
    %139 = arith.mulf %134, %138 : vector<2x16x16xf32>
    %140 = arith.truncf %139 : vector<2x16x16xf32> to vector<2x16x16xbf16>
    "tpu.trace_start"() <{level = 10 : i32, message = "bqk,bkd->bqd"}> : () -> ()
    %cst_42 = arith.constant dense<0.000000e+00> : vector<2x16x8xf32>
    %141 = tpu.matmul %140, %124, %cst_42 {dimension_numbers = #tpu.dot_dimension_numbers<[2], [1], [1], [2], [0, 0, 0, 1, 1, 2], [0], [0]>} : vector<2x16x16xbf16>, vector<2x16x8xbf16>, vector<2x16x8xf32> -> vector<2x16x8xf32>
    "tpu.trace_stop"() : () -> ()
    %142 = tpu.concatenate %63, %89, %115, %141 in 2 : vector<2x16x8xf32>, vector<2x16x8xf32>, vector<2x16x8xf32>, vector<2x16x8xf32> -> vector<2x16x32xf32>
    %143 = vector.shape_cast %142 : vector<2x16x32xf32> to vector<32x32xf32>
    %144 = arith.truncf %143 : vector<32x32xf32> to vector<32x32xbf16>
    %c0_43 = arith.constant 0 : index
    %c0_44 = arith.constant 0 : index
    %c0_45 = arith.constant 0 : index
    %145 = vector.load %arg7[%c0_43, %c0_44, %c0_45] : memref<1x32x32xbf16, #tpu.memory_space<vmem>>, vector<1x32x32xbf16>
    %146 = vector.shape_cast %145 : vector<1x32x32xbf16> to vector<32x32xbf16>
    %cst_46 = arith.constant dense<0.000000e+00> : vector<32x32xf32>
    %147 = tpu.matmul %144, %146, %cst_46 {dimension_numbers = #tpu.dot_dimension_numbers<[1], [0], [0], [1], [0, 0, 1, 1], [], []>} : vector<32x32xbf16>, vector<32x32xbf16>, vector<32x32xf32> -> vector<32x32xf32>
    %c0_47 = arith.constant 0 : index
    %c0_48 = arith.constant 0 : index
    %c0_49 = arith.constant 0 : index
    %148 = vector.load %arg8[%c0_47, %c0_48, %c0_49] : memref<1x1x32xf32, #tpu.memory_space<vmem>>, vector<1x1x32xf32>
    %149 = vector.shape_cast %148 : vector<1x1x32xf32> to vector<1x32xf32>
    %150 = vector.broadcast %149 : vector<1x32xf32> to vector<32x32xf32>
    %151 = arith.addf %147, %150 : vector<32x32xf32>
    %152 = arith.addf %4, %151 : vector<32x32xf32>
    %c0_50 = arith.constant 0 : index
    %c0_51 = arith.constant 0 : index
    %c0_52 = arith.constant 0 : index
    %153 = vector.load %arg9[%c0_50, %c0_51, %c0_52] : memref<1x1x32xf32, #tpu.memory_space<vmem>>, vector<1x1x32xf32>
    %154 = vector.shape_cast %153 : vector<1x1x32xf32> to vector<1x32xf32>
    %c0_53 = arith.constant 0 : index
    %c0_54 = arith.constant 0 : index
    %c0_55 = arith.constant 0 : index
    %155 = vector.load %arg10[%c0_53, %c0_54, %c0_55] : memref<1x1x32xf32, #tpu.memory_space<vmem>>, vector<1x1x32xf32>
    %156 = vector.shape_cast %155 : vector<1x1x32xf32> to vector<1x32xf32>
    %cst_56 = arith.constant dense<0.000000e+00> : vector<32xf32>
    %157 = vector.multi_reduction <add>, %152, %cst_56 [1] : vector<32x32xf32> to vector<32xf32>
    %158 = vector.shape_cast %157 : vector<32xf32> to vector<32x1xf32>
    %cst_57 = arith.constant 3.200000e+01 : f32
    %159 = vector.broadcast %cst_57 : f32 to vector<32x1xf32>
    %160 = arith.divf %158, %159 : vector<32x1xf32>
    %161 = vector.broadcast %160 : vector<32x1xf32> to vector<32x32xf32>
    %162 = arith.subf %152, %161 : vector<32x32xf32>
    %163 = arith.mulf %162, %162 : vector<32x32xf32>
    %cst_58 = arith.constant dense<0.000000e+00> : vector<32xf32>
    %164 = vector.multi_reduction <add>, %163, %cst_58 [1] : vector<32x32xf32> to vector<32xf32>
    %165 = vector.shape_cast %164 : vector<32xf32> to vector<32x1xf32>
    %cst_59 = arith.constant 0.0322580636 : f32
    %166 = vector.broadcast %cst_59 : f32 to vector<32x1xf32>
    %167 = arith.mulf %165, %166 : vector<32x1xf32>
    %168 = vector.broadcast %154 : vector<1x32xf32> to vector<32x32xf32>
    %169 = arith.mulf %168, %162 : vector<32x32xf32>
    %170 = math.sqrt %167 : vector<32x1xf32>
    %cst_60 = arith.constant 9.99999997E-7 : f32
    %171 = vector.broadcast %cst_60 : f32 to vector<32x1xf32>
    %172 = arith.addf %170, %171 : vector<32x1xf32>
    %173 = vector.broadcast %172 : vector<32x1xf32> to vector<32x32xf32>
    %174 = arith.divf %169, %173 : vector<32x32xf32>
    %175 = vector.broadcast %156 : vector<1x32xf32> to vector<32x32xf32>
    %176 = arith.addf %174, %175 : vector<32x32xf32>
    %177 = arith.truncf %176 : vector<32x32xf32> to vector<32x32xbf16>
    %c0_61 = arith.constant 0 : index
    %c0_62 = arith.constant 0 : index
    %c0_63 = arith.constant 0 : index
    %178 = vector.load %arg11[%c0_61, %c0_62, %c0_63] : memref<1x32x128xbf16, #tpu.memory_space<vmem>>, vector<1x32x128xbf16>
    %179 = vector.shape_cast %178 : vector<1x32x128xbf16> to vector<32x128xbf16>
    %cst_64 = arith.constant dense<0.000000e+00> : vector<32x128xf32>
    %180 = tpu.matmul %177, %179, %cst_64 {dimension_numbers = #tpu.dot_dimension_numbers<[1], [0], [0], [1], [0, 0, 1, 1], [], []>} : vector<32x32xbf16>, vector<32x128xbf16>, vector<32x128xf32> -> vector<32x128xf32>
    %c0_65 = arith.constant 0 : index
    %c0_66 = arith.constant 0 : index
    %c0_67 = arith.constant 0 : index
    %181 = vector.load %arg12[%c0_65, %c0_66, %c0_67] : memref<1x1x128xf32, #tpu.memory_space<vmem>>, vector<1x1x128xf32>
    %182 = vector.shape_cast %181 : vector<1x1x128xf32> to vector<1x128xf32>
    %183 = vector.broadcast %182 : vector<1x128xf32> to vector<32x128xf32>
    %184 = arith.addf %180, %183 : vector<32x128xf32>
    %cst_68 = arith.constant 5.000000e-01 : f32
    %185 = vector.broadcast %cst_68 : f32 to vector<32x128xf32>
    %186 = arith.mulf %185, %184 : vector<32x128xf32>
    %cst_69 = arith.constant 4.471500e-02 : f32
    %187 = vector.broadcast %cst_69 : f32 to vector<32x128xf32>
    %188 = arith.mulf %187, %184 : vector<32x128xf32>
    %189 = arith.mulf %188, %184 : vector<32x128xf32>
    %190 = arith.mulf %189, %184 : vector<32x128xf32>
    %191 = arith.addf %184, %190 : vector<32x128xf32>
    %cst_70 = arith.constant 0.797884583 : f32
    %192 = vector.broadcast %cst_70 : f32 to vector<32x128xf32>
    %193 = arith.mulf %192, %191 : vector<32x128xf32>
    %194 = math.tanh %193 : vector<32x128xf32>
    %cst_71 = arith.constant 1.000000e+00 : f32
    %195 = vector.broadcast %cst_71 : f32 to vector<32x128xf32>
    %196 = arith.addf %195, %194 : vector<32x128xf32>
    %197 = arith.mulf %186, %196 : vector<32x128xf32>
    %198 = arith.truncf %197 : vector<32x128xf32> to vector<32x128xbf16>
    %c0_72 = arith.constant 0 : index
    %c0_73 = arith.constant 0 : index
    %c0_74 = arith.constant 0 : index
    %199 = vector.load %arg13[%c0_72, %c0_73, %c0_74] : memref<1x128x32xbf16, #tpu.memory_space<vmem>>, vector<1x128x32xbf16>
    %200 = vector.shape_cast %199 : vector<1x128x32xbf16> to vector<128x32xbf16>
    %cst_75 = arith.constant dense<0.000000e+00> : vector<32x32xf32>
    %201 = tpu.matmul %198, %200, %cst_75 {dimension_numbers = #tpu.dot_dimension_numbers<[1], [0], [0], [1], [0, 0, 1, 1], [], []>} : vector<32x128xbf16>, vector<128x32xbf16>, vector<32x32xf32> -> vector<32x32xf32>
    %c0_76 = arith.constant 0 : index
    %c0_77 = arith.constant 0 : index
    %c0_78 = arith.constant 0 : index
    %202 = vector.load %arg14[%c0_76, %c0_77, %c0_78] : memref<1x1x32xf32, #tpu.memory_space<vmem>>, vector<1x1x32xf32>
    %203 = vector.shape_cast %202 : vector<1x1x32xf32> to vector<1x32xf32>
    %204 = vector.broadcast %203 : vector<1x32xf32> to vector<32x32xf32>
    %205 = arith.addf %201, %204 : vector<32x32xf32>
    %206 = arith.addf %152, %205 : vector<32x32xf32>
    %207 = vector.shape_cast %206 : vector<32x32xf32> to vector<2x16x32xf32>
    %c0_79 = arith.constant 0 : index
    %c0_80 = arith.constant 0 : index
    %c0_81 = arith.constant 0 : index
    %208 = vector.load %arg15[%c0_79, %c0_80, %c0_81] : memref<2x16x32xf32, #tpu.memory_space<vmem>>, vector<2x16x32xf32>
    tpu.vector_store %arg15[%c0_79, %c0_80, %c0_81], %207 {strides = array<i32>} : memref<2x16x32xf32, #tpu.memory_space<vmem>>, vector<2x16x32xf32>,
    return
  }
  func.func @transform_0(%arg0: i32) -> (i32, i32, i32) {
    %c0_i32 = arith.constant 0 : i32
    %c0_i32_0 = arith.constant 0 : i32
    %c0_i32_1 = arith.constant 0 : i32
    %c0_i32_2 = arith.constant 0 : i32
    return %c0_i32, %c0_i32_0, %c0_i32_1 : i32, i32, i32
  }
  func.func @transform_1(%arg0: i32) -> (i32, i32, i32) {
    %c0_i32 = arith.constant 0 : i32
    %c0_i32_0 = arith.constant 0 : i32
    %c0_i32_1 = arith.constant 0 : i32
    %c0_i32_2 = arith.constant 0 : i32
    return %c0_i32, %c0_i32_0, %c0_i32_1 : i32, i32, i32
  }
  func.func @transform_2(%arg0: i32) -> (i32, i32, i32) {
    %c0_i32 = arith.constant 0 : i32
    %c0_i32_0 = arith.constant 0 : i32
    %c0_i32_1 = arith.constant 0 : i32
    return %arg0, %c0_i32, %c0_i32_0 : i32, i32, i32
  }
  func.func @transform_3(%arg0: i32) -> (i32, i32, i32) {
    %c0_i32 = arith.constant 0 : i32
    %c0_i32_0 = arith.constant 0 : i32
    %c0_i32_1 = arith.constant 0 : i32
    return %arg0, %c0_i32, %c0_i32_0 : i32, i32, i32
  }
  func.func @transform_4(%arg0: i32) -> (i32, i32, i32) {
    %c0_i32 = arith.constant 0 : i32
    %c0_i32_0 = arith.constant 0 : i32
    %c0_i32_1 = arith.constant 0 : i32
    return %arg0, %c0_i32, %c0_i32_0 : i32, i32, i32
  }
  func.func @transform_5(%arg0: i32) -> (i32, i32, i32) {
    %c0_i32 = arith.constant 0 : i32
    %c0_i32_0 = arith.constant 0 : i32
    %c0_i32_1 = arith.constant 0 : i32
    return %arg0, %c0_i32, %c0_i32_0 : i32, i32, i32
  }
  func.func @transform_6(%arg0: i32) -> (i32, i32, i32) {
    %c0_i32 = arith.constant 0 : i32
    %c0_i32_0 = arith.constant 0 : i32
    %c0_i32_1 = arith.constant 0 : i32
    return %arg0, %c0_i32, %c0_i32_0 : i32, i32, i32
  }
  func.func @transform_7(%arg0: i32) -> (i32, i32, i32) {
    %c0_i32 = arith.constant 0 : i32
    %c0_i32_0 = arith.constant 0 : i32
    %c0_i32_1 = arith.constant 0 : i32
    return %arg0, %c0_i32, %c0_i32_0 : i32, i32, i32
  }
  func.func @transform_8(%arg0: i32) -> (i32, i32, i32) {
    %c0_i32 = arith.constant 0 : i32
    %c0_i32_0 = arith.constant 0 : i32
    %c0_i32_1 = arith.constant 0 : i32
    return %arg0, %c0_i32, %c0_i32_0 : i32, i32, i32
  }
  func.func @transform_9(%arg0: i32) -> (i32, i32, i32) {
    %c0_i32 = arith.constant 0 : i32
    %c0_i32_0 = arith.constant 0 : i32
    %c0_i32_1 = arith.constant 0 : i32
    return %arg0, %c0_i32, %c0_i32_0 : i32, i32, i32
  }
  func.func @transform_10(%arg0: i32) -> (i32, i32, i32) {
    %c0_i32 = arith.constant 0 : i32
    %c0_i32_0 = arith.constant 0 : i32
    %c0_i32_1 = arith.constant 0 : i32
    return %arg0, %c0_i32, %c0_i32_0 : i32, i32, i32
  }
  func.func @transform_11(%arg0: i32) -> (i32, i32, i32) {
    %c0_i32 = arith.constant 0 : i32
    %c0_i32_0 = arith.constant 0 : i32
    %c0_i32_1 = arith.constant 0 : i32
    return %arg0, %c0_i32, %c0_i32_0 : i32, i32, i32
  }
  func.func @transform_12(%arg0: i32) -> (i32, i32, i32) {
    %c0_i32 = arith.constant 0 : i32
    %c0_i32_0 = arith.constant 0 : i32
    %c0_i32_1 = arith.constant 0 : i32
    return %arg0, %c0_i32, %c0_i32_0 : i32, i32, i32
  }
  func.func @transform_13(%arg0: i32) -> (i32, i32, i32) {
    %c0_i32 = arith.constant 0 : i32
    %c0_i32_0 = arith.constant 0 : i32
    %c0_i32_1 = arith.constant 0 : i32
    return %arg0, %c0_i32, %c0_i32_0 : i32, i32, i32
  }
  func.func @transform_14(%arg0: i32) -> (i32, i32, i32) {
    %c0_i32 = arith.constant 0 : i32
    %c0_i32_0 = arith.constant 0 : i32
    %c0_i32_1 = arith.constant 0 : i32
    %c0_i32_2 = arith.constant 0 : i32
    return %c0_i32, %c0_i32_0, %c0_i32_1 : i32, i32, i32
  }
}

module attributes {stable_mosaic.version = 11 : i64} {
  func.func @_ctc_kernel(%arg0: i32, %arg1: memref<32x32xbf16, #tpu.memory_space<vmem>>, %arg2: memref<32x36xbf16, #tpu.memory_space<vmem>>, %arg3: memref<1x36xf32, #tpu.memory_space<vmem>>, %arg4: memref<2x11x1xi32, #tpu.memory_space<vmem>>, %arg5: memref<2x11xf32, #tpu.memory_space<vmem>>, %arg6: memref<2x11xf32, #tpu.memory_space<vmem>>, %arg7: memref<2x1xi32, #tpu.memory_space<vmem>>, %arg8: memref<2x1xi32, #tpu.memory_space<vmem>>, %arg9: memref<1x1xf32, #tpu.memory_space<vmem>>, %arg10: memref<16x11xf32, #tpu.memory_space<vmem>>, %arg11: memref<16x11xf32, #tpu.memory_space<vmem>>) attributes {dimension_semantics = [#tpu.dimension_semantics<arbitrary>], iteration_bounds = array<i64: 1>, scalar_prefetch = 0 : i64, scratch_operands = 2 : i64, tpu.core_type = #tpu.core_type<tc>, window_params = [{pipeline_mode = #tpu.pipeline_mode<synchronous>, transform_indices = @transform_0, window_bounds = array<i64: 32, 32>}, {pipeline_mode = #tpu.pipeline_mode<synchronous>, transform_indices = @transform_1, window_bounds = array<i64: 32, 36>}, {pipeline_mode = #tpu.pipeline_mode<synchronous>, transform_indices = @transform_2, window_bounds = array<i64: 1, 36>}, {pipeline_mode = #tpu.pipeline_mode<synchronous>, transform_indices = @transform_3, window_bounds = array<i64: 2, 11, 1>}, {pipeline_mode = #tpu.pipeline_mode<synchronous>, transform_indices = @transform_4, window_bounds = array<i64: 2, 11>}, {pipeline_mode = #tpu.pipeline_mode<synchronous>, transform_indices = @transform_5, window_bounds = array<i64: 2, 11>}, {pipeline_mode = #tpu.pipeline_mode<synchronous>, transform_indices = @transform_6, window_bounds = array<i64: 2, 1>}, {pipeline_mode = #tpu.pipeline_mode<synchronous>, transform_indices = @transform_7, window_bounds = array<i64: 2, 1>}, {pipeline_mode = #tpu.pipeline_mode<synchronous>, transform_indices = @transform_8, window_bounds = array<i64: 1, 1>}]} {
    %c0 = arith.constant 0 : index
    %c0_0 = arith.constant 0 : index
    %0 = vector.load %arg1[%c0, %c0_0] : memref<32x32xbf16, #tpu.memory_space<vmem>>, vector<32x32xbf16>
    %c0_1 = arith.constant 0 : index
    %c0_2 = arith.constant 0 : index
    %1 = vector.load %arg2[%c0_1, %c0_2] : memref<32x36xbf16, #tpu.memory_space<vmem>>, vector<32x36xbf16>
    %cst = arith.constant dense<0.000000e+00> : vector<32x36xf32>
    %2 = tpu.matmul %0, %1, %cst {dimension_numbers = #tpu.dot_dimension_numbers<[1], [0], [0], [1], [0, 0, 1, 1], [], []>} : vector<32x32xbf16>, vector<32x36xbf16>, vector<32x36xf32> -> vector<32x36xf32>
    %c0_3 = arith.constant 0 : index
    %c0_4 = arith.constant 0 : index
    %3 = vector.load %arg3[%c0_3, %c0_4] : memref<1x36xf32, #tpu.memory_space<vmem>>, vector<1x36xf32>
    %4 = vector.broadcast %3 : vector<1x36xf32> to vector<32x36xf32>
    %5 = arith.addf %2, %4 : vector<32x36xf32>
    %cst_5 = arith.constant dense<0xFF800000> : vector<32xf32>
    %6 = vector.multi_reduction <maximumf>, %5, %cst_5 [1] : vector<32x36xf32> to vector<32xf32>
    %7 = vector.shape_cast %6 : vector<32xf32> to vector<32x1xf32>
    %8 = vector.broadcast %7 : vector<32x1xf32> to vector<32x36xf32>
    %9 = arith.subf %5, %8 : vector<32x36xf32>
    %10 = math.exp %9 : vector<32x36xf32>
    %cst_6 = arith.constant dense<0.000000e+00> : vector<32xf32>
    %11 = vector.multi_reduction <add>, %10, %cst_6 [1] : vector<32x36xf32> to vector<32xf32>
    %12 = vector.shape_cast %11 : vector<32xf32> to vector<32x1xf32>
    %13 = math.log %12 : vector<32x1xf32>
    %14 = vector.broadcast %13 : vector<32x1xf32> to vector<32x36xf32>
    %15 = arith.subf %9, %14 : vector<32x36xf32>
    %16 = tpu.iota {dimensions = array<i32: 1>} : vector<11x36xi32>
    %17 = vector.extract_strided_slice %15 {offsets = [0, 0], sizes = [16, 36], strides = [1, 1]} : vector<32x36xf32> to vector<16x36xf32>
    %c0_7 = arith.constant 0 : index
    %c0_8 = arith.constant 0 : index
    %c0_9 = arith.constant 0 : index
    %18 = vector.load %arg4[%c0_7, %c0_8, %c0_9] : memref<2x11x1xi32, #tpu.memory_space<vmem>>, vector<1x11x1xi32>
    %19 = vector.shape_cast %18 : vector<1x11x1xi32> to vector<11x1xi32>
    %20 = vector.broadcast %19 : vector<11x1xi32> to vector<11x36xi32>
    %21 = arith.cmpi eq, %20, %16 : vector<11x36xi32>
    %22 = arith.extui %21 : vector<11x36xi1> to vector<11x36xi32>
    %23 = arith.sitofp %22 : vector<11x36xi32> to vector<11x36xf32>
    "tpu.trace_start"() <{level = 10 : i32, message = "tv,sv->ts"}> : () -> ()
    %cst_10 = arith.constant dense<0.000000e+00> : vector<16x11xf32>
    %24 = tpu.matmul %17, %23, %cst_10 {dimension_numbers = #tpu.dot_dimension_numbers<[1], [1], [0], [0], [0, 0, 1, 0], [], []>} : vector<16x36xf32>, vector<11x36xf32>, vector<16x11xf32> -> vector<16x11xf32>
    "tpu.trace_stop"() : () -> ()
    %c0_11 = arith.constant 0 : index
    %c0_12 = arith.constant 0 : index
    %25 = vector.load %arg10[%c0_11, %c0_12] : memref<16x11xf32, #tpu.memory_space<vmem>>, vector<16x11xf32>
    tpu.vector_store %arg10[%c0_11, %c0_12], %24 {strides = array<i32>} : memref<16x11xf32, #tpu.memory_space<vmem>>, vector<16x11xf32>,
    %26 = vector.extract_strided_slice %15 {offsets = [16, 0], sizes = [16, 36], strides = [1, 1]} : vector<32x36xf32> to vector<16x36xf32>
    %c1 = arith.constant 1 : index
    %c0_13 = arith.constant 0 : index
    %c0_14 = arith.constant 0 : index
    %27 = vector.load %arg4[%c1, %c0_13, %c0_14] : memref<2x11x1xi32, #tpu.memory_space<vmem>>, vector<1x11x1xi32>
    %28 = vector.shape_cast %27 : vector<1x11x1xi32> to vector<11x1xi32>
    %29 = vector.broadcast %28 : vector<11x1xi32> to vector<11x36xi32>
    %30 = arith.cmpi eq, %29, %16 : vector<11x36xi32>
    %31 = arith.extui %30 : vector<11x36xi1> to vector<11x36xi32>
    %32 = arith.sitofp %31 : vector<11x36xi32> to vector<11x36xf32>
    "tpu.trace_start"() <{level = 10 : i32, message = "tv,sv->ts"}> : () -> ()
    %cst_15 = arith.constant dense<0.000000e+00> : vector<16x11xf32>
    %33 = tpu.matmul %26, %32, %cst_15 {dimension_numbers = #tpu.dot_dimension_numbers<[1], [1], [0], [0], [0, 0, 1, 0], [], []>} : vector<16x36xf32>, vector<11x36xf32>, vector<16x11xf32> -> vector<16x11xf32>
    "tpu.trace_stop"() : () -> ()
    %c0_16 = arith.constant 0 : index
    %c0_17 = arith.constant 0 : index
    %34 = vector.load %arg11[%c0_16, %c0_17] : memref<16x11xf32, #tpu.memory_space<vmem>>, vector<16x11xf32>
    tpu.vector_store %arg11[%c0_16, %c0_17], %33 {strides = array<i32>} : memref<16x11xf32, #tpu.memory_space<vmem>>, vector<16x11xf32>,
    %35 = tpu.iota {dimensions = array<i32: 1>} : vector<2x11xi32>
    %c0_18 = arith.constant 0 : index
    %c0_19 = arith.constant 0 : index
    %36 = vector.load %arg5[%c0_18, %c0_19] : memref<2x11xf32, #tpu.memory_space<vmem>>, vector<2x11xf32>
    %c0_20 = arith.constant 0 : index
    %c0_21 = arith.constant 0 : index
    %37 = vector.load %arg6[%c0_20, %c0_21] : memref<2x11xf32, #tpu.memory_space<vmem>>, vector<2x11xf32>
    %c0_22 = arith.constant 0 : index
    %c0_23 = arith.constant 0 : index
    %38 = vector.load %arg7[%c0_22, %c0_23] : memref<2x1xi32, #tpu.memory_space<vmem>>, vector<2x1xi32>
    %c0_24 = arith.constant 0 : index
    %c0_25 = arith.constant 0 : index
    %39 = vector.load %arg8[%c0_24, %c0_25] : memref<2x1xi32, #tpu.memory_space<vmem>>, vector<2x1xi32>
    %cst_26 = arith.constant -1.000000e+30 : f32
    %40 = vector.broadcast %cst_26 : f32 to vector<2x2xf32>
    %c0_27 = arith.constant 0 : index
    %c0_28 = arith.constant 0 : index
    %41 = vector.load %arg10[%c0_27, %c0_28] : memref<16x11xf32, #tpu.memory_space<vmem>>, vector<1x11xf32>
    %c0_29 = arith.constant 0 : index
    %c0_30 = arith.constant 0 : index
    %42 = vector.load %arg11[%c0_29, %c0_30] : memref<16x11xf32, #tpu.memory_space<vmem>>, vector<1x11xf32>
    %43 = tpu.concatenate %41, %42 in 0 : vector<1x11xf32>, vector<1x11xf32> -> vector<2x11xf32>
    %c0_i32 = arith.constant 0 : i32
    %44 = vector.broadcast %c0_i32 : i32 to vector<2x11xi32>
    %45 = arith.cmpi eq, %35, %44 : vector<2x11xi32>
    %cst_31 = arith.constant -1.000000e+30 : f32
    %46 = vector.broadcast %cst_31 : f32 to vector<2x11xf32>
    %47 = arith.select %45, %43, %46 : vector<2x11xi1>, vector<2x11xf32>
    %c1_i32 = arith.constant 1 : i32
    %48 = vector.broadcast %c1_i32 : i32 to vector<2x11xi32>
    %49 = arith.cmpi eq, %35, %48 : vector<2x11xi32>
    %c0_i32_32 = arith.constant 0 : i32
    %50 = vector.broadcast %c0_i32_32 : i32 to vector<2x1xi32>
    %51 = arith.cmpi sgt, %39, %50 : vector<2x1xi32>
    %52 = vector.broadcast %51 : vector<2x1xi1> to vector<2x11xi1>
    %53 = arith.andi %49, %52 : vector<2x11xi1>
    %54 = arith.select %53, %43, %47 : vector<2x11xi1>, vector<2x11xf32>
    %55 = tpu.concatenate %40, %54 in 1 : vector<2x2xf32>, vector<2x11xf32> -> vector<2x13xf32>
    %c1_i32_33 = arith.constant 1 : i32
    %c15_i32 = arith.constant 15 : i32
    %56 = arith.addi %c1_i32_33, %c15_i32 : i32
    %c1_i32_34 = arith.constant 1 : i32
    %57 = scf.for %arg12 = %c1_i32_33 to %56 step %c1_i32_34 iter_args(%arg13 = %55) -> (vector<2x13xf32>)  : i32 {
      %93 = arith.index_cast %arg12 : i32 to index
      %c0_46 = arith.constant 0 : index
      %94 = vector.load %arg10[%93, %c0_46] : memref<16x11xf32, #tpu.memory_space<vmem>>, vector<1x11xf32>
      %95 = arith.index_cast %arg12 : i32 to index
      %c0_47 = arith.constant 0 : index
      %96 = vector.load %arg11[%95, %c0_47] : memref<16x11xf32, #tpu.memory_space<vmem>>, vector<1x11xf32>
      %97 = tpu.concatenate %94, %96 in 0 : vector<1x11xf32>, vector<1x11xf32> -> vector<2x11xf32>
      %98 = vector.extract_strided_slice %arg13 {offsets = [0, 2], sizes = [2, 11], strides = [1, 1]} : vector<2x13xf32> to vector<2x11xf32>
      %99 = vector.extract_strided_slice %arg13 {offsets = [0, 1], sizes = [2, 11], strides = [1, 1]} : vector<2x13xf32> to vector<2x11xf32>
      %100 = vector.extract_strided_slice %arg13 {offsets = [0, 0], sizes = [2, 11], strides = [1, 1]} : vector<2x13xf32> to vector<2x11xf32>
      %101 = arith.addf %100, %36 : vector<2x11xf32>
      %102 = arith.maximumf %98, %99 : vector<2x11xf32>
      %103 = arith.maximumf %102, %101 : vector<2x11xf32>
      %104 = arith.subf %98, %103 : vector<2x11xf32>
      %105 = math.exp %104 : vector<2x11xf32>
      %106 = arith.subf %99, %103 : vector<2x11xf32>
      %107 = math.exp %106 : vector<2x11xf32>
      %108 = arith.addf %105, %107 : vector<2x11xf32>
      %109 = arith.subf %101, %103 : vector<2x11xf32>
      %110 = math.exp %109 : vector<2x11xf32>
      %111 = arith.addf %108, %110 : vector<2x11xf32>
      %112 = math.log %111 : vector<2x11xf32>
      %113 = arith.addf %103, %112 : vector<2x11xf32>
      %114 = arith.addf %113, %97 : vector<2x11xf32>
      %115 = arith.addf %114, %37 : vector<2x11xf32>
      %116 = vector.broadcast %arg12 : i32 to vector<2x1xi32>
      %117 = arith.cmpi slt, %116, %38 : vector<2x1xi32>
      %118 = vector.shape_cast %117 : vector<2x1xi1> to vector<2x1xi1>
      %119 = vector.broadcast %118 : vector<2x1xi1> to vector<2x11xi1>
      %120 = arith.select %119, %115, %98 : vector<2x11xi1>, vector<2x11xf32>
      %121 = tpu.concatenate %40, %120 in 1 : vector<2x2xf32>, vector<2x11xf32> -> vector<2x13xf32>
      scf.yield %121 : vector<2x13xf32>
    }
    %c15_i32_35 = arith.constant 15 : i32
    %58 = vector.extract_strided_slice %57 {offsets = [0, 2], sizes = [2, 11], strides = [1, 1]} : vector<2x13xf32> to vector<2x11xf32>
    %c2_i32 = arith.constant 2 : i32
    %59 = vector.broadcast %c2_i32 : i32 to vector<2x1xi32>
    %60 = arith.muli %59, %39 : vector<2x1xi32>
    %61 = vector.broadcast %60 : vector<2x1xi32> to vector<2x11xi32>
    %62 = arith.cmpi eq, %35, %61 : vector<2x11xi32>
    %c1_i32_36 = arith.constant 1 : i32
    %63 = vector.broadcast %c1_i32_36 : i32 to vector<2x1xi32>
    %64 = arith.subi %60, %63 : vector<2x1xi32>
    %65 = vector.broadcast %64 : vector<2x1xi32> to vector<2x11xi32>
    %66 = arith.cmpi eq, %35, %65 : vector<2x11xi32>
    %c0_i32_37 = arith.constant 0 : i32
    %67 = vector.broadcast %c0_i32_37 : i32 to vector<2x1xi32>
    %68 = arith.cmpi sgt, %39, %67 : vector<2x1xi32>
    %69 = vector.broadcast %68 : vector<2x1xi1> to vector<2x11xi1>
    %70 = arith.andi %66, %69 : vector<2x11xi1>
    %71 = arith.ori %62, %70 : vector<2x11xi1>
    %cst_38 = arith.constant 0.000000e+00 : f32
    %cst_39 = arith.constant -1.000000e+30 : f32
    %72 = vector.broadcast %cst_38 : f32 to vector<2x11xf32>
    %73 = vector.broadcast %cst_39 : f32 to vector<2x11xf32>
    %74 = arith.select %71, %72, %73 : vector<2x11xi1>, vector<2x11xf32>
    %75 = arith.addf %58, %74 : vector<2x11xf32>
    %cst_40 = arith.constant dense<0xFF800000> : vector<2xf32>
    %76 = vector.multi_reduction <maximumf>, %75, %cst_40 [1] : vector<2x11xf32> to vector<2xf32>
    %77 = vector.shape_cast %76 : vector<2xf32> to vector<2x1xf32>
    %78 = vector.broadcast %77 : vector<2x1xf32> to vector<2x11xf32>
    %79 = arith.subf %75, %78 : vector<2x11xf32>
    %80 = math.exp %79 : vector<2x11xf32>
    %cst_41 = arith.constant dense<0.000000e+00> : vector<2xf32>
    %81 = vector.multi_reduction <add>, %80, %cst_41 [1] : vector<2x11xf32> to vector<2xf32>
    %82 = vector.shape_cast %81 : vector<2xf32> to vector<2x1xf32>
    %83 = math.log %82 : vector<2x1xf32>
    %84 = arith.addf %77, %83 : vector<2x1xf32>
    %85 = vector.shape_cast %84 : vector<2x1xf32> to vector<1x2x1xf32>
    %cst_42 = arith.constant dense<0.000000e+00> : vector<1xf32>
    %86 = vector.multi_reduction <add>, %85, %cst_42 [1, 2] : vector<1x2x1xf32> to vector<1xf32>
    %87 = vector.shape_cast %86 : vector<1xf32> to vector<1x1x1xf32>
    %88 = vector.extract %87[0, 0, 0] : f32 from vector<1x1x1xf32>
    %89 = vector.broadcast %88 : f32 to vector<1x1xf32>
    %cst_43 = arith.constant -5.000000e-01 : f32
    %90 = vector.broadcast %cst_43 : f32 to vector<1x1xf32>
    %91 = arith.mulf %89, %90 : vector<1x1xf32>
    %c0_44 = arith.constant 0 : index
    %c0_45 = arith.constant 0 : index
    %92 = vector.load %arg9[%c0_44, %c0_45] : memref<1x1xf32, #tpu.memory_space<vmem>>, vector<1x1xf32>
    tpu.vector_store %arg9[%c0_44, %c0_45], %91 {strides = array<i32>} : memref<1x1xf32, #tpu.memory_space<vmem>>, vector<1x1xf32>,
    return
  }
  func.func @transform_0(%arg0: i32) -> (i32, i32) {
    %c0_i32 = arith.constant 0 : i32
    %c0_i32_0 = arith.constant 0 : i32
    %c0_i32_1 = arith.constant 0 : i32
    return %c0_i32, %c0_i32_0 : i32, i32
  }
  func.func @transform_1(%arg0: i32) -> (i32, i32) {
    %c0_i32 = arith.constant 0 : i32
    %c0_i32_0 = arith.constant 0 : i32
    %c0_i32_1 = arith.constant 0 : i32
    return %c0_i32, %c0_i32_0 : i32, i32
  }
  func.func @transform_2(%arg0: i32) -> (i32, i32) {
    %c0_i32 = arith.constant 0 : i32
    %c0_i32_0 = arith.constant 0 : i32
    %c0_i32_1 = arith.constant 0 : i32
    return %c0_i32, %c0_i32_0 : i32, i32
  }
  func.func @transform_3(%arg0: i32) -> (i32, i32, i32) {
    %c0_i32 = arith.constant 0 : i32
    %c0_i32_0 = arith.constant 0 : i32
    %c0_i32_1 = arith.constant 0 : i32
    %c0_i32_2 = arith.constant 0 : i32
    return %c0_i32, %c0_i32_0, %c0_i32_1 : i32, i32, i32
  }
  func.func @transform_4(%arg0: i32) -> (i32, i32) {
    %c0_i32 = arith.constant 0 : i32
    %c0_i32_0 = arith.constant 0 : i32
    %c0_i32_1 = arith.constant 0 : i32
    return %c0_i32, %c0_i32_0 : i32, i32
  }
  func.func @transform_5(%arg0: i32) -> (i32, i32) {
    %c0_i32 = arith.constant 0 : i32
    %c0_i32_0 = arith.constant 0 : i32
    %c0_i32_1 = arith.constant 0 : i32
    return %c0_i32, %c0_i32_0 : i32, i32
  }
  func.func @transform_6(%arg0: i32) -> (i32, i32) {
    %c0_i32 = arith.constant 0 : i32
    %c0_i32_0 = arith.constant 0 : i32
    %c0_i32_1 = arith.constant 0 : i32
    return %c0_i32, %c0_i32_0 : i32, i32
  }
  func.func @transform_7(%arg0: i32) -> (i32, i32) {
    %c0_i32 = arith.constant 0 : i32
    %c0_i32_0 = arith.constant 0 : i32
    %c0_i32_1 = arith.constant 0 : i32
    return %c0_i32, %c0_i32_0 : i32, i32
  }
  func.func @transform_8(%arg0: i32) -> (i32, i32) {
    %c0_i32 = arith.constant 0 : i32
    %c0_i32_0 = arith.constant 0 : i32
    %c0_i32_1 = arith.constant 0 : i32
    return %c0_i32, %c0_i32_0 : i32, i32
  }
}

</mosaic_0001>

<bundles_post_ra>
// kernel: bert_ctc_forward.3
= control target key start
LH: loop header
LB: loop body
LE: loop exit
PB: predicated region body
PF: predicated region fallthrough
CT: control target
= control target key end

     0   :  { %13 = vsyncpa [#allocation5], 0  ;;  %v570_v1 = vmov 0   ;;  %vm65_vm0 = vcmask 261120   ;;  %vm91_vm1 = vcmask 293888   ;;  %v140_v40 = vlaneseq  ;;  %s724_s27 = smov 1   ;;  %s759_s0 = inlined_call_operand.vmem [shape: bf16[32,32], index: 0, kind: input, shape index: {}]   ;;  %s760_s1 = inlined_call_operand.vmem [shape: bf16[32,36], index: 1, kind: input, shape index: {}]   ;;  %s761_s2 = inlined_call_operand.vmem [shape: f32[1,36], index: 2, kind: input, shape index: {}]   ;;  %s762_s3 = inlined_call_operand.vmem [shape: s32[2,11,1], index: 3, kind: input, shape index: {}]   ;;  %s763_s4 = inlined_call_operand.vmem [shape: f32[2,11], index: 4, kind: input, shape index: {}]   ;;  %s764_s5 = inlined_call_operand.vmem [shape: f32[2,11], index: 5, kind: input, shape index: {}]   ;;  %s765_s6 = inlined_call_operand.vmem [shape: s32[2,1], index: 6, kind: input, shape index: {}]   ;;  %s766_s7 = inlined_call_operand.vmem [shape: s32[2,1], index: 7, kind: input, shape index: {}]   ;;  %s767_s8 = inlined_call_operand.hbm [shape: f32[1,1], index: 8, kind: output, shape index: {}]  }
   0x1   :  { %v461_v0 = vld [vmem:[%s760_s1 + $0x8] sm:$0xff]  ;;  %493 = vset.pattern.permute.xlu2 %v570_v1  ;;  %v450_v2 = vld [vmem:[%s762_s3 + $0x18] sm:$0x7]  ;;  %495 = vset.pattern.permute.xlu1 %v570_v1  ;;  %v460_v3 = vld [vmem:[%s760_s1] sm:$0xff]  ;;  %v571_v46 = vmov 0.0   ;;  %vm191_vm7 = vcmask 89088  }
   0x2   :  { %78 = vmatpush.bf16.msra.mxu0 %v461_v0  ;;  %462 = vmatpush.bf16.msra.mxu3 %v461_v0  ;;  %v143_v4 = vld [vmem:[%s762_s3 + $0x8] sm:$0x7]  ;;  %v458_v5 = vld [vmem:[%s759_s0] sm:$0xff]  ;;  %v449_v20 = vld [vmem:[%s762_s3 + $0x10] sm:$0xff]  ;;  %v666_v42 = vand.u32 127, %v140_v40  ;;  %vm255_vm8 = vcmask 1040384  }
   0x3   :  { %201 = vperm.xlu2 %493, %v450_v2   ;;  %148 = vperm.xlu1 %495, %v143_v4   ;;  %v459_v6 = vld [vmem:[%s759_s0 + $0x8] sm:$0xff]  ;;  %v496_v8 = vld [vmem:[%s761_s2] ss:$0 sm:$0xff]  ;;  %vm272_vm13 = vcmask 15360  }
   0x4   :  { %494 = vset.pattern.permute.xlu0 %v570_v1  ;;  %v142_v50 = vld [vmem:[%s762_s3] sm:$0xff]  ;;  %vm259_vm9 = vcmp.eq.s32.totalorder %v666_v42, 1  ;;  %vm257_vm11 = vcmp.eq.s32.totalorder %v666_v42, 0  ;;  %s572_s3 = smov 2  }
   0x5   :  { %v681_v51 = vld [vmem:[%s766_s7] sm:$0x3] }
   0x6   :  { %79 = vmatpush.bf16.msra.mxu0 %v460_v3  ;;  %463 = vmatpush.bf16.msra.mxu3 %v460_v3  ;;  %vm260_vm5 = vcmp.gt.s32.totalorder %v681_v51, 0 }
   0x7   :  { %v261_v52 = vsel %vm260_vm5, 1, %v570_v1 }
   0x9   :  { %441 = vmatmul.msk.bf16.vlgmr.msra.gmra.mxu0 %vm65_vm0, %v458_v5  ;;  %442 = vmatmul.msk.bf16.vlgmr.msra.gmra.mxu3 %vm65_vm0, %v459_v6 }
  0x5d   :  { %v202_v21 = vpop.permute.xlu2 %201 }
  0x5e   :  { %vm204_vm2 = vcmp.eq.s32.totalorder %v202_v21, %v666_v42  ;;  %v719_v21 = vld [vmem:[%s765_s6] sm:$0x3] }
  0x5f   :  { %v452_v47 = vsel %vm204_vm2, 1.0, %v571_v46 }
  0x60   :  { %453 = vmatpush.xpose.msk.msra.mxu2 %vm91_vm1, %v452_v47 }
  0x75   :  { %v149_v22 = vpop.permute.xlu1 %148 }
  0x76   :  { %vm151_vm3 = vcmp.eq.s32.totalorder %v149_v22, %v666_v42 }
  0x77   :  { %v444_v48 = vsel %vm151_vm3, 1.0, %v571_v46 }
  0x78   :  { %445 = vmatpush.xpose.msk.msra.mxu1 %vm91_vm1, %v444_v48 }
  0x86   :  { %v81_v7 = vpop.f32.mrf.mxu0 }
  0x87   :  { %v82_v14 = vadd.f32 %v496_v8, %v81_v7 }
  0x89   :  { %v92_v18 = vsel %vm91_vm1, %v82_v14, -inf }
  0x8c   :  { %v86_v9 = vpop.f32.mrf.mxu3 }
  0x8d   :  { %v87_v10 = vadd.f32 %v496_v8, %v86_v9 }
  0x8e   :  { %v83_v11 = vpop.f32.mrf.mxu0 }
  0x8f   :  { %v84_v12 = vadd.f32 %v496_v8, %v83_v11  ;;  %v98_v13 = vsel %vm91_vm1, %v87_v10, -inf }
  0x90   :  { %99 = vmax.xlane.f32.xlu0 %v98_v13 }
  0x91   :  { %v95_v15 = vsel %vm91_vm1, %v84_v12, -inf }
  0x92   :  { %96 = vmax.xlane.f32.xlu2 %v95_v15 }
  0x94   :  { %v88_v16 = vpop.f32.mrf.mxu3 }
  0x95   :  { %v89_v17 = vadd.f32 %v496_v8, %v88_v16 }
  0x97   :  { %v101_v19 = vsel %vm91_vm1, %v89_v17, -inf }
  0x98   :  { %102 = vmax.xlane.f32.xlu1 %v101_v19  ;;  %93 = vmax.xlane.f32.xlu0 %v92_v18  ;;  %v709_v19 = vld [vmem:[%s763_s4] sm:$0x3] }
  0xac   :  { %198 = vperm.xlu0 %494, %v449_v20   ;;  %v714_v20 = vld [vmem:[%s764_s5] sm:$0x3] }
 0x103   :  { %v100_v23 = vpop.xlane.xlu0 %99 }
 0x104   :  { %v106_v33 = vsub.f32 %v87_v10, %v100_v23 }
 0x105   :  { %v97_v24 = vpop.xlane.xlu2 %96 }
 0x106   :  { %v657_v25 = vsub.f32 %v84_v12, %v97_v24  ;;  %v112_v36 = vmul.f32 1.442695, %v106_v33 }
 0x108   :  { %v110_v26 = vmul.f32 1.442695, %v657_v25 }
 0x10a   :  { %497 = vpow2.f32 %v110_v26 }
 0x10b   :  { %v103_v27 = vpop.xlane.xlu1 %102  ;;  %v94_v28 = vpop.xlane.xlu0 %93 }
 0x10c   :  { %v107_v29 = vsub.f32 %v89_v17, %v103_v27  ;;  %v660_v30 = vsub.f32 %v82_v14, %v94_v28 }
 0x10e   :  { %v114_v31 = vmul.f32 1.442695, %v107_v29  ;;  %v108_v32 = vmul.f32 1.442695, %v660_v30 }
 0x110   :  { %v498_v34 = vpop.eup %497  ;;  %499 = vpow2.f32 %v114_v31 }
 0x111   :  { %501 = vpow2.f32 %v108_v32  ;;  %v119_v35 = vsel %vm91_vm1, %v498_v34, 0.0 }
 0x112   :  { %120 = vadd.xlane.f32.xlu0 %v119_v35  ;;  %503 = vpow2.f32 %v112_v36 }
 0x116   :  { %v500_v37 = vpop.eup %499 }
 0x117   :  { %v502_v38 = vpop.eup %501  ;;  %v125_v39 = vsel %vm91_vm1, %v500_v37, 0.0 }
 0x118   :  { %126 = vadd.xlane.f32.xlu2 %v125_v39  ;;  %v116_v41 = vsel %vm91_vm1, %v502_v38, 0.0  ;;  %v504_v43 = vpop.eup %503 }
 0x119   :  { %117 = vadd.xlane.f32.xlu1 %v116_v41  ;;  %v122_v44 = vsel %vm91_vm1, %v504_v43, 0.0 }
 0x11e   :  { %v199_v45 = vpop.permute.xlu0 %198 }
 0x11f   :  { %vm203_vm4 = vcmp.eq.s32.totalorder %v199_v45, %v666_v42 }
 0x120   :  { %v451_v49 = vsel %vm203_vm4, 1.0, %v571_v46 }
 0x121   :  { %123 = vadd.xlane.f32.xlu1 %v122_v44  ;;  %454 = vmatpush.xpose.msk.msra.mxu2 %vm91_vm1, %v451_v49 }
 0x13a   :  { %145 = vperm.xlu1 %495, %v142_v50  }
 0x142   :  { %263 = vperm.xlu1 %495, %v261_v52  }
 0x185   :  { %v121_v62 = vpop.xlane.xlu0 %120 }
 0x18b   :  { %v127_v55 = vpop.xlane.xlu2 %126 }
 0x18c   :  { %v118_v53 = vpop.xlane.xlu1 %117 }
 0x194   :  { %v124_v54 = vpop.xlane.xlu1 %123 }
 0x195   :  { %505 = vlog2.f32 %v124_v54 }
 0x196   :  { %507 = vlog2.f32 %v127_v55 }
 0x197   :  { %509 = vlog2.f32 %v118_v53 }
 0x198   :  { %511 = vlog2.f32 %v121_v62 }
 0x19b   :  { %v506_v56 = vpop.eup %505 }
 0x19c   :  { %v133_v57 = vmul.f32 0.6931472, %v506_v56  ;;  %v508_v59 = vpop.eup %507 }
 0x19d   :  { %v135_v60 = vmul.f32 0.6931472, %v508_v59  ;;  %v510_v63 = vpop.eup %509 }
 0x19e   :  { %v138_v58 = vsub.f32 %v106_v33, %v133_v57  ;;  %v129_v0 = vmul.f32 0.6931472, %v510_v63  ;;  %v512_v5 = vpop.eup %511 }
 0x19f   :  { %v139_v61 = vsub.f32 %v107_v29, %v135_v60  ;;  %v131_v6 = vmul.f32 0.6931472, %v512_v5 }
 0x1a0   :  { %455 = vmatmul.msk.f32.vlgmr.msra.gmra.mxu2 %vm91_vm1, %v138_v58  ;;  %v136_v4 = vsub.f32 %v660_v30, %v129_v0 }
 0x1a1   :  { %v137_v7 = vsub.f32 %v657_v25, %v131_v6 }
 0x1a8   :  { %456 = vmatmul.msk.f32.gmra.mxu2 %vm91_vm1, %v139_v61 }
 0x1ac   :  { %v146_v2 = vpop.permute.xlu1 %145 }
 0x1ad   :  { %vm150_vm6 = vcmp.eq.s32.totalorder %v146_v2, %v666_v42 }
 0x1ae   :  { %v443_v3 = vsel %vm150_vm6, 1.0, %v571_v46 }
 0x1af   :  { %446 = vmatpush.xpose.msk.msra.mxu1 %vm91_vm1, %v443_v3 }
 0x1b2   :  { %447 = vmatmul.msk.f32.vlgmr.msra.gmra.mxu1 %vm91_vm1, %v136_v4 }
 0x1b4   :  { %v696_v11 = vpop.permute.xlu1 %263 }
 0x1b5   :  { %vm265_vm10 = vcmp.eq.s32.totalorder %v696_v11, 1 }
 0x1b6   :  { %vm266_vm12 = vmand %vm259_vm9, %vm265_vm10 }
 0x1ba   :  { %448 = vmatmul.msk.f32.gmra.mxu1 %vm91_vm1, %v137_v7 }
 0x223   :  { %v238_v8 = vpop.f32.mrf.mxu2 }
 0x224   :  { %244 = vst.msk [vmem:[#allocation3] sm:$0xff] %vm191_vm7, %v238_v8 }
 0x22b   :  { %v241_v9 = vpop.f32.mrf.mxu2  ;;  %v251_v12 = vld [vmem:[#allocation3] sm:$0x1] }
 0x22c   :  { %245 = vst.msk [vmem:[#allocation3 + $0x8] sm:$0xff] %vm191_vm7, %v241_v9  ;;  %v253_v13 = vrot.slane %v251_v12, 7 }
 0x22f   :  { %v185_v10 = vpop.f32.mrf.mxu1 }
 0x230   :  { %192 = vst.msk [vmem:[#allocation2] sm:$0xff] %vm191_vm7, %v185_v10 }
 0x237   :  { %v188_v14 = vpop.f32.mrf.mxu1  ;;  %v250_v15 = vld [vmem:[#allocation2] sm:$0x1] }
 0x238   :  { %193 = vst.msk [vmem:[#allocation2 + $0x8] sm:$0xff] %vm191_vm7, %v188_v14  ;;  %v256_v16 = vsel %vm255_vm8, %v250_v15, %v253_v13 }
 0x239   :  { %v258_v17 = vsel %vm257_vm11, %v256_v16, -1e+30 }
 0x23a   :  { %v267_v18 = vsel %vm266_vm12, %v256_v16, %v258_v17 }
 0x23b   :  { %269 = vrot.lane.b32.xlu2 %v267_v18, %s572_s3 }
 0x295   :  { %v270_v22 = vpop.permute.xlu2 %269 }
 0x296   :  { %v273_v23 = vsel %vm272_vm13, -1e+30, %v270_v22  }
 0x297 LB: > { %s573_s4 = smov 1   ;;  %v289_v24 = vadd.f32 %v564_v23, %v709_v19  ;;  %s574_s5 = smov 2   ;;  %v577_v33 = vmov 0   ;;  %v339_v43 = vstv %s568_s27  ;;  %s568_s27 = sphi %s724_s27, %s279_s27   ;;  %v564_v23 = vphi %v273_v23, %v768_v23  }
 0x298   : > { %291 = vrot.lane.b32.xlu0 %v564_v23, %s573_s4  ;;  %s575_s6 = smov 127   ;;  %s576_s28 = smov 126   ;;  %513 = vset.pattern.permute.xlu2 %v577_v33  ;;  %vm340_vm14 = vcmp.lt.s32.totalorder %v339_v43, %v719_v21 }
 0x299   : > { %s283_s29 = scalar_lea.vmem [#allocation3], %s568_s27  ;;  %s281_s30 = scalar_lea.vmem [#allocation2], %s568_s27  ;;  %514 = vset.pattern.permute.xlu0 %v577_v33  ;;  %v341_v44 = vsel %vm340_vm14, 1, %v577_v33 }
 0x29a   : > { %v284_v29 = vld [vmem:[%s283_s29] sm:$0x1]  ;;  %s279_s27 = sadd.s32 1, %s568_s27  }
 0x29b   : > { %v286_v30 = vrot.slane %v284_v29, 7  ;;  %v282_v31 = vld [vmem:[%s281_s30] sm:$0x1]  ;;  %p276_p0 = scmp.ge.s32.totalorder %s279_s27, 16  }
 0x29c   :  { %523 = vset.pattern.permute.xlu0 (%p276_p0), %v570_v1  ;;  %v348_v63 = vmul.u32 (%p276_p0), 2, %v681_v51  ;;  %v578_v4 = vmov (%p276_p0), -1e+30   ;;  %vm366_vm4 = vcmask (%p276_p0), 99344   ;;  %s579_s9 = smov (%p276_p0), 126   ;;  %vm377_vm5 = vcmask (%p276_p0), 82944  }
 0x29d   : > { %v288_v32 = vsel %vm255_vm8, %v282_v31, %v286_v30  ;;  %vm384_vm6 = vcmask (%p276_p0), 1024   ;;  %s580_s10 = smov (%p276_p0), [#allocation4]   ;;  %s406_s14 = sshll.u32 (%p276_p0), %s767_s8, 4  ;;  %vm397_vm7 = vcmask (%p276_p0), 0   ;;  %s407_s14 = int_to_ptr.hbm [resolvable:$true] %s406_s14 }
 0x29e   :  { %v457_v0 = vadd.s32 (%p276_p0), 4294967295, %v348_v63  ;;  %s404_s11 = sshll.u32 (%p276_p0), %s580_s10, 4  ;;  %s405_s11 = int_to_ptr.vmem [resolvable:$true] %s404_s11 }
 0x2a0   : > { %296 = vrot.lane.b32.xlu0 %v289_v24, %s574_s5 }
 0x2a8   : > { %330 = vrot.lane.b32.xlu0 %v288_v32, %s574_s5 }
 0x2b0   :  { %355 = vperm.xlu0 (%p276_p0), %523, %v457_v0  }
 0x2b8   :  { %350 = vperm.xlu0 (%p276_p0), %523, %v348_v63  }
 0x30a   : > { %v292_v25 = vpop.permute.xlu0 %291 }
 0x30b   : > { %v294_v26 = vmax.f32 %v564_v23, %v292_v25 }
 0x312   : > { %v297_v27 = vpop.permute.xlu0 %296 }
 0x313   : > { %v299_v28 = vmax.f32 %v294_v26, %v297_v27 }
 0x315   : > { %304 = vrot.lane.b32.xlu1 %v299_v28, %s575_s6  ;;  %v300_v45 = vsub.f32 %v564_v23, %v299_v28 }
 0x317   : > { %v301_v46 = vmul.f32 1.442695, %v300_v45 }
 0x31a   : > { %v331_v55 = vpop.permute.xlu0 %330 }
 0x31d   : > { %315 = vrot.lane.b32.xlu1 %v299_v28, %s576_s28 }
 0x322   :  { %v356_v2 = vpop.permute.xlu0 (%p276_p0), %355 }
 0x323   :  { %vm357_vm0 = vcmp.eq.s32.totalorder (%p276_p0), %v666_v42, %v356_v2 }
 0x324   :  { %vm358_vm1 = vmand (%p276_p0), %vm357_vm0, %vm265_vm10 }
 0x325   : > { %335 = vrot.lane.b32.xlu1 %v714_v20, %s574_s5 }
 0x32a   :  { %v351_v3 = vpop.permute.xlu0 (%p276_p0), %350 }
 0x32b   :  { %vm352_vm2 = vcmp.eq.s32.totalorder (%p276_p0), %v666_v42, %v351_v3 }
 0x32c   :  { %vm359_vm3 = vmor (%p276_p0), %vm352_vm2, %vm358_vm1 }
 0x32d   :  { %v360_v5 = vsel (%p276_p0), %vm359_vm3, 0.0, %v578_v4 }
 0x32e   :  { %362 = vrot.lane.b32.xlu1 (%p276_p0), %v360_v5, %s572_s3 }
 0x387   : > { %v305_v34 = vpop.permute.xlu1 %304 }
 0x388   : > { %v307_v35 = vsub.f32 %v564_v23, %v305_v34 }
 0x38a   : > { %v308_v36 = vmul.f32 1.442695, %v307_v35 }
 0x38c   : > { %515 = vpow2.f32 %v308_v36 }
 0x38f   : > { %v316_v37 = vpop.permute.xlu1 %315 }
 0x390   : > { %v318_v38 = vsub.f32 %v289_v24, %v316_v37 }
 0x392   : > { %v516_v39 = vpop.eup %515  ;;  %v319_v40 = vmul.f32 1.442695, %v318_v38 }
 0x393   : > { %311 = vrot.lane.b32.xlu2 %v516_v39, %s573_s4 }
 0x394   : > { %517 = vpow2.f32 %v319_v40 }
 0x395   : > { %519 = vpow2.f32 %v301_v46 }
 0x397   : > { %v336_v58 = vpop.permute.xlu1 %335 }
 0x39a   : > { %v518_v41 = vpop.eup %517 }
 0x39b   : > { %322 = vrot.lane.b32.xlu2 %v518_v41, %s574_s5  ;;  %v520_v48 = vpop.eup %519 }
 0x3a0   :  { %v363_v1 = vpop.permute.xlu1 (%p276_p0), %362 }
 0x3a3   : > { %343 = vperm.xlu2 %513, %v341_v44  }
 0x3ed   : > { %v312_v47 = vpop.permute.xlu2 %311 }
 0x3ee   : > { %v314_v49 = vadd.f32 %v520_v48, %v312_v47 }
 0x3f5   : > { %v323_v50 = vpop.permute.xlu2 %322 }
 0x3f6   : > { %v325_v52 = vadd.f32 %v323_v50, %v314_v49 }
 0x3f8   : > { %521 = vlog2.f32 %v325_v52 }
 0x3fd   : > { %v344_v57 = vpop.permute.xlu2 %343 }
 0x3fe   : > { %v522_v53 = vpop.eup %521  ;;  %vm345_vm15 = vcmp.eq.s32.totalorder %v344_v57, 1 }
 0x3ff   : > { %v327_v54 = vmul.f32 0.6931472, %v522_v53 }
 0x401   : > { %v328_v56 = vadd.f32 %v327_v54, %v299_v28 }
 0x403   : > { %v333_v59 = vadd.f32 %v331_v55, %v328_v56 }
 0x405   : > { %v338_v60 = vadd.f32 %v336_v58, %v333_v59  ;;  %278 = sbr.rel (!%p276_p0) target bundleno = 663 (0x297), region = 62 }
 0x407   : > { %v346_v61 = vsel %vm345_vm15, %v338_v60, %v564_v23 }
 0x408   : > { %v347_v62 = vsel %vm272_vm13, -1e+30, %v346_v61  }
 0x409   : > { %v768_v23 = vmov %v347_v62  ;;  %v365_v51 = vadd.f32 (%p276_p0), %v363_v1, %v347_v62 }
 0x40b   :  { %v367_v6 = vsel %vm366_vm4, %v365_v51, -inf }
 0x40c   :  { %368 = vmax.xlane.f32.xlu1 %v367_v6 }
 0x47f   :  { %v369_v7 = vpop.xlane.xlu1 %368 }
 0x480   :  { %v370_v8 = vsub.f32 %v365_v51, %v369_v7 }
 0x482   :  { %v371_v9 = vmul.f32 1.442695, %v370_v8 }
 0x484   :  { %524 = vpow2.f32 %v371_v9 }
 0x48a   :  { %v525_v10 = vpop.eup %524 }
 0x48b   :  { %374 = vrot.lane.b32.xlu2 %v525_v10, %s579_s9 }
 0x4e5   :  { %v375_v11 = vpop.permute.xlu2 %374 }
 0x4e6   :  { %v378_v42 = vsel %vm377_vm5, %v375_v11, 0.0 }
 0x4e7   :  { %379 = vadd.xlane.f32.xlu2 %v378_v42 }
 0x55a   :  { %v380_v12 = vpop.xlane.xlu2 %379 }
 0x55b   :  { %526 = vlog2.f32 %v380_v12 }
 0x561   :  { %v527_v13 = vpop.eup %526 }
 0x562   :  { %v382_v14 = vmul.f32 0.6931472, %v527_v13 }
 0x564   :  { %v383_v15 = vadd.f32 %v382_v14, %v369_v7 }
 0x566   :  { %v385_v16 = vsel %vm384_vm6, %v383_v15, 0.0 }
 0x567   :  { %386 = vadd.xlane.f32.xlu0 %v385_v16 }
 0x5da   :  { %v387_v17 = vpop.xlane.xlu0 %386 }
 0x5db   :  { %v388_v18 = vrot.slane %v387_v17, 4 }
 0x5dd   :  { %v389_v19 = vadd.f32 %v388_v18, %v387_v17 }
 0x5df   :  { %v390_v20 = vrot.slane %v389_v19, 2 }
 0x5e1   :  { %v391_v21 = vadd.f32 %v390_v20, %v389_v19 }
 0x5e3   :  { %v392_v22 = vrot.slane %v391_v21, 1 }
 0x5e5   :  { %v393_v23 = vadd.f32 %v392_v22, %v391_v21 }
 0x5e7   :  { %464 = vpush %v393_v23 }
 0x618   :  { %s465_s15 = spop %464 }
 0x619   :  { %v395_v24 = vstv %s465_s15 }
 0x61a   :  { %v396_v25 = vmul.f32 -0.5, %v395_v24 }
 0x61c   :  { %398 = vst.msk [vmem:[#allocation4] sm:$0x1] %vm397_vm7, %v396_v25 }
 0x61d   :  { %409 = dma.vmem_to_hbm [thread:$0]  %s405_s11, 16, %s407_s14, [#allocation5]  }
 0x61e   :  { %560 = dma.done.wait [#allocation5], 16  }
 0x61f   :  { %561 = vsyncadd [#allocation5], 4294967280 }
 0x620   :  { %414 = vsyncpa [#allocation5], 1 }

// kernel: bert_ctc_forward.2
= control target key start
LH: loop header
LB: loop body
LE: loop exit
PB: predicated region body
PF: predicated region fallthrough
CT: control target
= control target key end

     0   :  { %s2480_s29 = smov 0   ;;  %s3054_s0 = inlined_call_operand.vmem [shape: f32[2,1,16], index: 0, kind: input, shape index: {}]   ;;  %s3055_s1 = inlined_call_operand.vmem [shape: f32[2,16,32], index: 1, kind: input, shape index: {}]   ;;  %s3056_s2 = inlined_call_operand.vmem [shape: f32[2,1,32], index: 2, kind: input, shape index: {}]   ;;  %s3057_s3 = inlined_call_operand.vmem [shape: f32[2,1,32], index: 3, kind: input, shape index: {}]   ;;  %s3058_s4 = inlined_call_operand.vmem [shape: bf16[2,32,96], index: 4, kind: input, shape index: {}]   ;;  %s3059_s5 = inlined_call_operand.vmem [shape: f32[2,1,96], index: 5, kind: input, shape index: {}]   ;;  %s3060_s6 = inlined_call_operand.vmem [shape: bf16[2,32,32], index: 6, kind: input, shape index: {}]   ;;  %s3061_s7 = inlined_call_operand.vmem [shape: f32[2,1,32], index: 7, kind: input, shape index: {}]   ;;  %s3062_s8 = inlined_call_operand.vmem [shape: f32[2,1,32], index: 8, kind: input, shape index: {}]   ;;  %s3063_s9 = inlined_call_operand.vmem [shape: f32[2,1,32], index: 9, kind: input, shape index: {}]   ;;  %s3064_s10 = inlined_call_operand.vmem [shape: bf16[2,32,128], index: 10, kind: input, shape index: {}]   ;;  %s3065_s11 = inlined_call_operand.vmem [shape: f32[2,1,128], index: 11, kind: input, shape index: {}]   ;;  %s3066_s12 = inlined_call_operand.vmem [shape: bf16[2,128,32], index: 12, kind: input, shape index: {}]   ;;  %s3067_s13 = inlined_call_operand.vmem [shape: f32[2,1,32], index: 13, kind: input, shape index: {}]   ;;  %s3068_s14 = inlined_call_operand.vmem [shape: f32[2,16,32], index: 14, kind: output, shape index: {}]  }
   0x1   :  { %3072 = sst [smem:[#allocation4_spill]] %s3054_s0 }
   0x2   :  { %3073 = sst [smem:[#allocation5_spill]] %s3057_s3 }
   0x3   :  { %3074 = sst [smem:[#allocation6_spill]] %s3058_s4 }
   0x4   :  { %3075 = sst [smem:[#allocation7_spill]] %s3060_s6 }
   0x5 LB: > { %3076 = sst [smem:[#allocation2_spill]] %s2388_s29  ;;  %s2098_s30 = sadd.s32 4294967295, %s2388_s29   ;;  %s2388_s29 = sphi %s2480_s29, %s24_s29  }
   0x6   : > { %p2101_p0 = scmp.ge.s32.totalorder %s2388_s29, 1  ;;  %p501_p1 = scmp.lt.s32.totalorder %s2388_s29, 3 }
   0x8   : > { %p502_p2 = pnand %p2101_p0, %p501_p1 }
   0xa   : > { %505 = sbr.rel (%p502_p2) target bundleno = 2099 (0x833), region = 76 }
   0xf   : > { %p581_p3 = scmp.lt.s32.totalorder %s2098_s30, 1  ;;  %s3078_s4 = sld [smem:[#allocation6_spill]] }
  0x10   : > { %s3079_s6 = sld [smem:[#allocation7_spill]]  ;;  %p2110_p4 = scmp.ne.s32.totalorder %s2098_s30, 0 }
  0x11   : > { %s2488_s15 = scalar_select %p581_p3, %s2098_s30, 1 }
  0x13   : > { %s2191_s22 = sshll.u32 %s2488_s15, 4  ;;  %s605_s3 = scalar_lea.vmem %s3062_s8, %s2488_s15 }
  0x14   : > { %s608_s25 = scalar_lea.vmem %s3063_s9, %s2488_s15  ;;  %s624_s23 = scalar_lea.vmem %s3067_s13, %s2488_s15 }
  0x15   : > { %s2506_s28 = scalar_lea.vmem %s3078_s4, %s2191_s22  ;;  %s2528_s4 = scalar_lea.vmem %s3064_s10, %s2191_s22 }
  0x16   : > { %s2511_s29 = scalar_lea.vmem %s3079_s6, %s2191_s22  ;;  %s616_s6 = scalar_lea.vmem %s3065_s11, %s2488_s15 }
  0x17   : > { %3080 = sst [smem:[#allocation3_spill]] %s2511_s29  ;;  %s2194_s29 = sshll.u32 %s2488_s15, 6 }
  0x18   : > { %s2538_s19 = scalar_lea.vmem %s3066_s12, %s2194_s29  ;;  %629 = sbr.rel (%p2110_p4) target bundleno = 34 (0x22), region = 80 }
  0x1d   : > { %v630_v0 = vld [vmem:[%s3055_s1] sm:$0xff]  ;;  %vm634_vm0 = vcmask 261120   ;;  %v631_v1 = vld [vmem:[%s3055_s1 + $0x8] sm:$0xff]  ;;  %v632_v2 = vld [vmem:[%s3055_s1 + $0x10] sm:$0xff] }
  0x1e   : > { %635 = vst.msk [vmem:[%s3068_s14] sm:$0xff] %vm634_vm0, %v630_v0  ;;  %v633_v3 = vld [vmem:[%s3055_s1 + $0x18] sm:$0xff] }
  0x1f   : > { %636 = vst.msk [vmem:[%s3068_s14 + $0x8] sm:$0xff] %vm634_vm0, %v631_v1 }
  0x20   : > { %637 = vst.msk [vmem:[%s3068_s14 + $0x10] sm:$0xff] %vm634_vm0, %v632_v2 }
  0x21   : > { %638 = vst.msk [vmem:[%s3068_s14 + $0x18] sm:$0xff] %vm634_vm0, %v633_v3 }
  0x22 PF: > { %vm647_vm1 = vcmask 261120   ;;  %v2390_v12 = vmov 32.0   ;;  %v2196_v39 = vld [vmem:[%s2506_s28 + $0x8] sm:$0xff]  ;;  %v2195_v44 = vld [vmem:[%s2506_s28] sm:$0xff]  ;;  %s3081_s26 = scalar_lea.vmem %s3056_s2, %s2488_s15  ;;  %s3088_s16 = sld [smem:[#allocation5_spill]] }
  0x23   : > { %2272 = vrcp.f32 %v2390_v12  ;;  %855 = vmatpush.bf16.msra.mxu0 %v2196_v39  ;;  %s3090_s18 = scalar_lea.vmem %s3059_s5, %s2488_s15  ;;  %s2391_s30 = smov 88  }
  0x24   : > { %s2392_s21 = smov 96   ;;  %s2393_s20 = smov 120  }
  0x25   : > { %v639_v5 = vld [vmem:[%s3068_s14] sm:$0xff]  ;;  %s2394_s28 = smov 72   ;;  %s2395_s24 = smov 112  }
  0x26   : > { %v648_v7 = vsel %vm647_vm1, %v639_v5, 0.0  ;;  %v640_v9 = vld [vmem:[%s3068_s14 + $0x8] sm:$0xff]  ;;  %s2397_s22 = smov 56   ;;  %s2398_s27 = smov 104  }
  0x27   : > { %v641_v4 = vld [vmem:[%s3068_s14 + $0x10] sm:$0xff]  ;;  %649 = vadd.xlane.f32.xlu0 %v648_v7  ;;  %v651_v11 = vsel %vm647_vm1, %v640_v9, 0.0  ;;  %856 = vmatpush.bf16.msra.mxu0 %v2195_v44  ;;  %s3091_s0 = sld [smem:[#allocation4_spill]] }
  0x28   : > { %v654_v6 = vsel %vm647_vm1, %v641_v4, 0.0  ;;  %v642_v8 = vld [vmem:[%s3068_s14 + $0x18] sm:$0xff]  ;;  %s3089_s17 = scalar_lea.vmem %s3088_s16, %s2488_s15  ;;  %s2399_s16 = smov 64  }
  0x29   : > { %655 = vadd.xlane.f32.xlu1 %v654_v6  ;;  %v657_v10 = vsel %vm647_vm1, %v642_v8, 0.0  ;;  %v2273_v13 = vpop.eup %2272 }
  0x2a   : > { %v661_v14 = vmul.f32 32.0, %v2273_v13  ;;  %vm665_vm2 = vweird.f32 %v2273_v13 }
  0x2c   : > { %v662_v15 = vsub.f32 1.0, %v661_v14 }
  0x2e   : > { %v663_v16 = vmul.f32 %v2273_v13, %v662_v15 }
  0x2f   : > { %652 = vadd.xlane.f32.xlu0 %v651_v11 }
  0x30   : > { %v664_v17 = vadd.f32 %v2273_v13, %v663_v16 }
  0x31   : > { %658 = vadd.xlane.f32.xlu1 %v657_v10 }
  0x32   : > { %v2584_v18 = vsel %vm665_vm2, %v2273_v13, %v664_v17 }
  0x9a   : > { %v650_v20 = vpop.xlane.xlu0 %649 }
  0x9b   : > { %v667_v22 = vmul.f32 %v2584_v18, %v650_v20 }
  0x9c   : > { %v656_v19 = vpop.xlane.xlu1 %655 }
  0x9d   : > { %v669_v21 = vmul.f32 %v2584_v18, %v656_v19  ;;  %v2590_v24 = vsub.f32 %v639_v5, %v667_v22 }
  0x9f   : > { %v2588_v23 = vsub.f32 %v641_v4, %v669_v21  ;;  %v675_v26 = vmul.f32 %v2590_v24, %v2590_v24 }
  0xa1   : > { %v677_v25 = vmul.f32 %v2588_v23, %v2588_v23  ;;  %v679_v28 = vsel %vm647_vm1, %v675_v26, 0.0 }
  0xa2   : > { %680 = vadd.xlane.f32.xlu2 %v679_v28  ;;  %v653_v30 = vpop.xlane.xlu0 %652 }
  0xa3   : > { %v685_v27 = vsel %vm647_vm1, %v677_v25, 0.0  ;;  %v668_v32 = vmul.f32 %v2584_v18, %v653_v30 }
  0xa4   : > { %v659_v29 = vpop.xlane.xlu1 %658  ;;  %686 = vadd.xlane.f32.xlu0 %v685_v27 }
  0xa5   : > { %v670_v31 = vmul.f32 %v2584_v18, %v659_v29  ;;  %v2602_v34 = vsub.f32 %v640_v9, %v668_v32 }
  0xa7   : > { %v2600_v33 = vsub.f32 %v642_v8, %v670_v31  ;;  %v676_v36 = vmul.f32 %v2602_v34, %v2602_v34 }
  0xa9   : > { %v678_v35 = vmul.f32 %v2600_v33, %v2600_v33  ;;  %v682_v38 = vsel %vm647_vm1, %v676_v36, 0.0 }
  0xaa   : > { %683 = vadd.xlane.f32.xlu2 %v682_v38 }
  0xab   : > { %v688_v37 = vsel %vm647_vm1, %v678_v35, 0.0 }
  0xac   : > { %689 = vadd.xlane.f32.xlu1 %v688_v37 }
 0x115   : > { %v681_v40 = vpop.xlane.xlu2 %680 }
 0x116   : > { %v691_v42 = vmul.f32 0.032258064, %v681_v40 }
 0x117   : > { %v687_v41 = vpop.xlane.xlu0 %686 }
 0x118   : > { %v693_v43 = vmul.f32 0.032258064, %v687_v41  ;;  %2274 = vrsqrt.f32 %v691_v42  ;;  %vm709_vm3 = vcmp.eq.f32.partialorder %v691_v42, inf  ;;  %v712_v4 = vand.u32 2147483648, %v691_v42  ;;  %v2262_v41 = vld [vmem:[%s3081_s26] ss:$0 sm:$0xff] }
 0x119   : > { %vm711_vm6 = vcmp.eq.f32.partialorder %v691_v42, 0.0  ;;  %s2396_s26 = smov 80  }
 0x11a   : > { %2276 = vrsqrt.f32 %v693_v43  ;;  %vm733_vm4 = vcmp.eq.f32.partialorder %v693_v43, inf  ;;  %v736_v2 = vand.u32 2147483648, %v693_v43  ;;  %vm735_vm5 = vcmp.eq.f32.partialorder %v693_v43, 0.0 }
 0x11d   : > { %v684_v46 = vpop.xlane.xlu2 %683 }
 0x11e   : > { %v2275_v47 = vpop.eup %2274  ;;  %v692_v49 = vmul.f32 0.032258064, %v684_v46 }
 0x11f   : > { %v690_v45 = vpop.xlane.xlu1 %689  ;;  %v703_v51 = vmul.f32 %v2275_v47, %v691_v42 }
 0x120   : > { %v694_v48 = vmul.f32 0.032258064, %v690_v45  ;;  %v2277_v50 = vpop.eup %2276  ;;  %vm721_vm9 = vcmp.eq.f32.partialorder %v692_v49, inf  ;;  %v724_v26 = vand.u32 2147483648, %v692_v49  ;;  %vm723_vm10 = vcmp.eq.f32.partialorder %v692_v49, 0.0 }
 0x121   : > { %v727_v52 = vmul.f32 %v2277_v50, %v693_v43  ;;  %v704_v53 = vmul.f32 %v2275_v47, %v703_v51  ;;  %v700_v51 = vmul.f32 %v2262_v41, %v2588_v23 }
 0x122   : > { %2278 = vrsqrt.f32 %v694_v48  ;;  %vm745_vm7 = vcmp.eq.f32.partialorder %v694_v48, inf  ;;  %v748_v19 = vand.u32 2147483648, %v694_v48  ;;  %vm747_vm8 = vcmp.eq.f32.partialorder %v694_v48, 0.0 }
 0x123   : > { %2280 = vrsqrt.f32 %v692_v49  ;;  %v728_v54 = vmul.f32 %v2277_v50, %v727_v52  ;;  %v705_v55 = vmul.f32 0.5, %v704_v53  ;;  %v698_v53 = vmul.f32 %v2262_v41, %v2590_v24 }
 0x125   : > { %v729_v56 = vmul.f32 0.5, %v728_v54  ;;  %v706_v57 = vsub.f32 1.5, %v705_v55 }
 0x127   : > { %v730_v59 = vsub.f32 1.5, %v729_v56  ;;  %v707_v61 = vmul.f32 %v2275_v47, %v706_v57 }
 0x128   : > { %v2279_v58 = vpop.eup %2278 }
 0x129   : > { %v2281_v60 = vpop.eup %2280  ;;  %v739_v62 = vmul.f32 %v2279_v58, %v694_v48  ;;  %v731_v63 = vmul.f32 %v2277_v50, %v730_v59  ;;  %v708_v1 = vmul.f32 %v707_v61, %v691_v42 }
 0x12a   : > { %v715_v0 = vmul.f32 %v2281_v60, %v692_v49 }
 0x12b   : > { %v740_v3 = vmul.f32 %v2279_v58, %v739_v62  ;;  %v732_v5 = vmul.f32 %v731_v63, %v693_v43  ;;  %v710_v7 = vsel %vm709_vm3, %v691_v42, %v708_v1 }
 0x12c   : > { %v716_v6 = vmul.f32 %v2281_v60, %v715_v0  ;;  %v713_v11 = vsel %vm711_vm6, %v712_v4, %v710_v7 }
 0x12d   : > { %v741_v8 = vmul.f32 0.5, %v740_v3  ;;  %v734_v9 = vsel %vm733_vm4, %v693_v43, %v732_v5  ;;  %v750_v13 = vadd.f32 1e-06, %v713_v11  ;;  %v701_v5 = vmul.f32 %v2262_v41, %v2600_v33 }
 0x12e   : > { %v717_v10 = vmul.f32 0.5, %v716_v6  ;;  %v737_v14 = vsel %vm735_vm5, %v736_v2, %v734_v9 }
 0x12f   : > { %v742_v12 = vsub.f32 1.5, %v741_v8  ;;  %v752_v16 = vadd.f32 1e-06, %v737_v14  ;;  %2282 = vrcp.f32 %v750_v13  ;;  %v763_v42 = vand.u32 2147483647, %v750_v13 }
 0x130   : > { %v718_v15 = vsub.f32 1.5, %v717_v10  ;;  %v765_v44 = vand.u32 2147483648, %v750_v13  ;;  %vm759_vm14 = vweird.f32 %v750_v13  ;;  %v699_v8 = vmul.f32 %v2262_v41, %v2602_v34 }
 0x131   : > { %v743_v17 = vmul.f32 %v2279_v58, %v742_v12  ;;  %2284 = vrcp.f32 %v752_v16  ;;  %v793_v45 = vand.u32 2147483647, %v752_v16  ;;  %vm789_vm13 = vweird.f32 %v752_v16  ;;  %v2263_v12 = vld [vmem:[%s3089_s17] ss:$0 sm:$0xff]  ;;  %s3093_s17 = scalar_lea.vmem %s3061_s7, %s2488_s15 }
 0x132   : > { %v719_v20 = vmul.f32 %v2281_v60, %v718_v15  ;;  %vm2622_vm15 = vcmp.eq.f32.partialorder %v763_v42, 8.507059e+37  ;;  %v766_v23 = vor.u32 1.1754944e-38, %v765_v44 }
 0x133   : > { %v744_v21 = vmul.f32 %v743_v17, %v694_v48  ;;  %vm794_vm3 = vcmp.eq.f32.partialorder %v793_v45, 8.507059e+37 }
 0x134   : > { %v720_v22 = vmul.f32 %v719_v20, %v692_v49 }
 0x135   : > { %v746_v25 = vsel %vm745_vm7, %v694_v48, %v744_v21  ;;  %v2283_v29 = vpop.eup %2282 }
 0x136   : > { %v722_v27 = vsel %vm721_vm9, %v692_v49, %v720_v22  ;;  %v749_v28 = vsel %vm747_vm8, %v748_v19, %v746_v25  ;;  %v755_v36 = vmul.f32 %v2283_v29, %v750_v13  ;;  %vm760_vm12 = vweird.f32 %v2283_v29 }
 0x137   : > { %v725_v30 = vsel %vm723_vm10, %v724_v26, %v722_v27  ;;  %v753_v31 = vadd.f32 1e-06, %v749_v28  ;;  %v2285_v32 = vpop.eup %2284  ;;  %v795_v49 = vand.u32 2147483648, %v752_v16  ;;  %vm2632_vm2 = vmor %vm759_vm14, %vm760_vm12  ;;  %vm879_vm12 = vcmask 64512  }
 0x138   : > { %v2612_v35 = vadd.f32 1e-06, %v725_v30  ;;  %v785_v37 = vmul.f32 %v2285_v32, %v752_v16  ;;  %v756_v38 = vsub.f32 1.0, %v755_v36  ;;  %vm790_vm11 = vweird.f32 %v2285_v32 }
 0x139   : > { %2286 = vrcp.f32 %v753_v31  ;;  %vm2628_vm0 = vmor %vm789_vm13, %vm790_vm11  ;;  %v796_v61 = vor.u32 1.1754944e-38, %v795_v49  ;;  %v810_v62 = vand.u32 2147483648, %v753_v31  ;;  %v808_v1 = vand.u32 2147483647, %v753_v31 }
 0x13a   : > { %2288 = vrcp.f32 %v2612_v35  ;;  %v786_v39 = vsub.f32 1.0, %v785_v37  ;;  %v757_v40 = vmul.f32 %v2283_v29, %v756_v38  ;;  %v780_v63 = vand.u32 2147483648, %v2612_v35 }
 0x13b   : > { %v778_v3 = vand.u32 2147483647, %v2612_v35  ;;  %vm804_vm6 = vweird.f32 %v753_v31  ;;  %vm774_vm7 = vweird.f32 %v2612_v35  ;;  %v811_v10 = vor.u32 1.1754944e-38, %v810_v62 }
 0x13c   : > { %v787_v43 = vmul.f32 %v2285_v32, %v786_v39  ;;  %v758_v47 = vadd.f32 %v2283_v29, %v757_v40  ;;  %v781_v11 = vor.u32 1.1754944e-38, %v780_v63  ;;  %vm809_vm10 = vcmp.eq.f32.partialorder %v808_v1, 8.507059e+37 }
 0x13d   : > { %vm779_vm11 = vcmp.eq.f32.partialorder %v778_v3, 8.507059e+37  ;;  %vm941_vm13 = vcmask 130048   ;;  %vm1558_vm14 = vcmask 195584  }
 0x13e   : > { %v788_v48 = vadd.f32 %v2285_v32, %v787_v43  ;;  %v762_v59 = vsel %vm2632_vm2, %v2283_v29, %v758_v47  ;;  %v2264_v29 = vld [vmem:[%s3090_s18] ss:$0 sm:$0xff] }
 0x13f   : > { %v2287_v46 = vpop.eup %2286  ;;  %v767_v6 = vsel %vm2622_vm15, %v766_v23, %v762_v59 }
 0x140   : > { %v2289_v50 = vpop.eup %2288  ;;  %v800_v52 = vmul.f32 %v2287_v46, %v753_v31  ;;  %v792_v24 = vsel %vm2628_vm0, %v2285_v32, %v788_v48  ;;  %vm805_vm4 = vweird.f32 %v2287_v46  ;;  %v768_v14 = vmul.f32 %v767_v6, %v698_v53 }
 0x141   : > { %v770_v55 = vmul.f32 %v2289_v50, %v2612_v35  ;;  %vm775_vm5 = vweird.f32 %v2289_v50  ;;  %v797_v4 = vsel %vm794_vm3, %v796_v61, %v792_v24  ;;  %vm806_vm8 = vmor %vm804_vm6, %vm805_vm4 }
 0x142   : > { %v801_v58 = vsub.f32 1.0, %v800_v52  ;;  %vm776_vm9 = vmor %vm774_vm7, %vm775_vm5  ;;  %v798_v33 = vmul.f32 %v797_v4, %v700_v51  ;;  %v817_v22 = vadd.f32 %v2263_v12, %v768_v14 }
 0x143   : > { %v771_v60 = vsub.f32 1.0, %v770_v55 }
 0x144   : > { %v802_v0 = vmul.f32 %v2287_v46, %v801_v58  ;;  %v819_v20 = vadd.f32 %v2263_v12, %v798_v33 }
 0x145   : > { %v772_v2 = vmul.f32 %v2289_v50, %v771_v60 }
 0x146   : > { %v803_v7 = vadd.f32 %v2287_v46, %v802_v0 }
 0x147   : > { %v773_v9 = vadd.f32 %v2289_v50, %v772_v2 }
 0x148   : > { %v807_v13 = vsel %vm806_vm8, %v2287_v46, %v803_v7 }
 0x149   : > { %v777_v15 = vsel %vm776_vm9, %v2289_v50, %v773_v9  ;;  %v812_v34 = vsel %vm809_vm10, %v811_v10, %v807_v13  ;;  %v2707_v10 = vld [vmem:[%s3091_s0] ss:$0 sm:$0xff] }
 0x14a   : > { %v782_v16 = vsel %vm779_vm11, %v781_v11, %v777_v15  ;;  %v813_v17 = vmul.f32 %v812_v34, %v701_v5 }
 0x14b   : > { %v783_v19 = vmul.f32 %v782_v16, %v699_v8  ;;  %v2702_v8 = vld [vmem:[%s3091_s0 + $0x1] ss:$0 sm:$0xff] }
 0x14c   : > { %v820_v21 = vadd.f32 %v2263_v12, %v813_v17 }
 0x14d   : > { %v818_v25 = vadd.f32 %v2263_v12, %v783_v19 }
 0x14e   : > { %v822_v26 = vpack.c.bf16 %v820_v21, %v819_v20 }
 0x14f   : > { %v821_v27 = vpack.c.bf16 %v818_v25, %v817_v22 }
 0x151   : > { %2119 = vmatmul.msk.bf16.vlgmr.msra.gmra.mxu0 %vm647_vm1, %v821_v27 }
 0x161   : > { %2120 = vmatmul.msk.bf16.gmra.mxu0 %vm647_vm1, %v822_v26 }
 0x1ce   : > { %v858_v28 = vpop.f32.mrf.mxu0 }
 0x1cf   : > { %v859_v30 = vadd.f32 %v2264_v29, %v858_v28 }
 0x1d1   : > { %v868_v32 = vpack.c.bf16 %v859_v30, %v859_v30 }
 0x1d3   : > { %v874_v37 = vunpack.c.l.b16 %v868_v32 }
 0x1d6   : > { %v860_v31 = vpop.f32.mrf.mxu0 }
 0x1d7   : > { %v861_v35 = vadd.f32 %v2264_v29, %v860_v31 }
 0x1d9   : > { %v869_v36 = vpack.c.bf16 %v861_v35, %v861_v35 }
 0x1db   : > { %v875_v38 = vunpack.c.l.b16 %v869_v36 }
 0x1dd   : > { %v2659_v39 = vpack.c.b16 %v875_v38, %v874_v37 }
 0x1de   : > { %v863_v40 = vpop.f32.mrf.mxu0 }
 0x1df   : > { %1042 = vrot.lane.b32.xlu1 %v2659_v39, %s2391_s30  ;;  %877 = vrot.lane.b32.xlu0 %v2659_v39, %s2392_s21  ;;  %v864_v41 = vadd.f32 %v2264_v29, %v863_v40 }
 0x1e1   : > { %v870_v43 = vpack.c.bf16 %v864_v41, %v864_v41 }
 0x1e3   : > { %v902_v46 = vunpack.c.l.b16 %v870_v43 }
 0x1e6   : > { %v865_v42 = vpop.f32.mrf.mxu0 }
 0x1e7   : > { %v866_v44 = vadd.f32 %v2264_v29, %v865_v42 }
 0x1e9   : > { %v871_v45 = vpack.c.bf16 %v866_v44, %v866_v44 }
 0x1eb   : > { %v903_v47 = vunpack.c.l.b16 %v871_v45 }
 0x1ed   : > { %v2663_v48 = vpack.c.b16 %v903_v47, %v902_v46 }
 0x1ef   : > { %1064 = vrot.lane.b32.xlu1 %v2663_v48, %s2393_s20  ;;  %1066 = vrot.lane.b32.xlu0 %v2663_v48, %s2391_s30 }
 0x1f0   : > { %905 = vrot.lane.b32.xlu2 %v2663_v48, %s2392_s21  ;;  %s2400_s21 = smov 48  }
 0x1f7   : > { %1350 = vrot.lane.b32.xlu1 %v2659_v39, %s2394_s28  ;;  %1194 = vrot.lane.b32.xlu0 %v2659_v39, %s2395_s24 }
 0x1f8   : > { %1040 = vrot.lane.b32.xlu2 %v2659_v39, %s2393_s20  ;;  %s2401_s20 = smov 40  }
 0x1ff   : > { %1374 = vrot.lane.b32.xlu1 %v2663_v48, %s2394_s28  ;;  %1218 = vrot.lane.b32.xlu0 %v2663_v48, %s2395_s24  ;;  %s2402_s28 = smov 8   ;;  %s2403_s24 = smov 16  }
 0x200   : > { %1196 = vrot.lane.b32.xlu2 %v2659_v39, %s2396_s26 }
 0x207   : > { %1149 = vrot.lane.b32.xlu1 %v2659_v39, %s2397_s22  ;;  %1372 = vrot.lane.b32.xlu0 %v2663_v48, %s2398_s27 }
 0x208   : > { %1220 = vrot.lane.b32.xlu2 %v2663_v48, %s2396_s26  ;;  %s3092_s26 = sld [smem:[#allocation3_spill]] }
 0x20f   : > { %995 = vrot.lane.b32.xlu1 %v2659_v39, %s2399_s16 }
 0x210   : > { %1348 = vrot.lane.b32.xlu2 %v2659_v39, %s2398_s27 }
 0x217   : > { %1020 = vrot.lane.b32.xlu1 %v2663_v48, %s2399_s16 }
 0x24a   : > { %v906_v49 = vpop.permute.xlu2 %905 }
 0x24b   : > { %v911_v50 = vsel %vm879_vm12, %v906_v49, 0 }
 0x24c   : > { %920 = vmatpush.bf16.xpose.msra.mxu2 %v911_v50 }
 0x251   : > { %v1043_v51 = vpop.permute.xlu1 %1042  ;;  %v878_v52 = vpop.permute.xlu0 %877 }
 0x252   : > { %v1041_v53 = vpop.permute.xlu2 %1040  ;;  %v884_v54 = vsel %vm879_vm12, %v878_v52, 0  ;;  %v1048_v55 = vsel %vm879_vm12, %v1043_v51, 0 }
 0x253   : > { %2122 = vmatmul.msk.bf16.vlgmr.msra.gmra.mxu2 %vm879_vm12, %v2663_v48  ;;  %893 = vmatpush.bf16.xpose.msra.mxu1 %v884_v54 }
 0x25a   : > { %v1197_v56 = vpop.permute.xlu2 %1196  ;;  %2121 = vmatmul.msk.bf16.vlgmr.msra.gmra.mxu1 %vm879_vm12, %v2659_v39 }
 0x25b   : > { %1057 = vmatpush.bf16.xpose.msrb.mxu1 %v1048_v55  ;;  %v1202_v57 = vsel %vm879_vm12, %v1197_v56, 0 }
 0x261   : > { %v1065_v23 = vpop.permute.xlu1 %1064  ;;  %v1067_v24 = vpop.permute.xlu0 %1066 }
 0x262   : > { %v1221_v58 = vpop.permute.xlu2 %1220  ;;  %v1072_v59 = vsel %vm879_vm12, %v1067_v24, 0 }
 0x263   : > { %1211 = vmatpush.bf16.xpose.msra.mxu1 %v1202_v57  ;;  %v1226_v60 = vsel %vm879_vm12, %v1221_v58, 0  ;;  %1081 = vmatpush.bf16.xpose.msrb.mxu2 %v1072_v59 }
 0x269   : > { %v1351_v61 = vpop.permute.xlu1 %1350  ;;  %v1195_v63 = vpop.permute.xlu0 %1194 }
 0x26a   : > { %v1356_v62 = vsel %vm879_vm12, %v1351_v61, 0  ;;  %2125 = vmatmul.msk.bf16.vlgmr.msrb.gmra.mxu1 %vm879_vm12, %v1041_v53  ;;  %2126 = vmatmul.msk.bf16.vlgmr.msrb.gmra.mxu2 %vm879_vm12, %v1065_v23  ;;  %v1349_v5 = vpop.permute.xlu2 %1348 }
 0x26b   : > { %1235 = vmatpush.bf16.xpose.msra.mxu2 %v1226_v60  ;;  %1365 = vmatpush.bf16.xpose.msrb.mxu1 %v1356_v62 }
 0x271   : > { %v1375_v0 = vpop.permute.xlu1 %1374  ;;  %v1219_v2 = vpop.permute.xlu0 %1218 }
 0x272   : > { %v1380_v1 = vsel %vm879_vm12, %v1375_v0, 0 }
 0x273   : > { %1389 = vmatpush.bf16.xpose.msrb.mxu2 %v1380_v1 }
 0x279   : > { %v1150_v3 = vpop.permute.xlu1 %1149  ;;  %v1373_v7 = vpop.permute.xlu0 %1372 }
 0x27a   : > { %2129 = vmatmul.msk.bf16.vlgmr.msra.gmra.mxu1 %vm879_vm12, %v1195_v63  ;;  %2130 = vmatmul.msk.bf16.vlgmr.msra.gmra.mxu2 %vm879_vm12, %v1219_v2 }
 0x281   : > { %v996_v4 = vpop.permute.xlu1 %995 }
 0x282   : > { %1008 = vmatpush.bf16.msrb.mxu0 %v996_v4 }
 0x289   : > { %v1021_v6 = vpop.permute.xlu1 %1020 }
 0x28a   : > { %1033 = vmatpush.bf16.msra.mxu3 %v1021_v6  ;;  %2133 = vmatmul.msk.bf16.vlgmr.msrb.gmra.mxu1 %vm879_vm12, %v1349_v5 }
 0x28b   : > { %2134 = vmatmul.msk.bf16.vlgmr.msrb.gmra.mxu2 %vm879_vm12, %v1373_v7 }
 0x28e   : > { %1162 = vmatpush.bf16.msrb.mxu3 %v1150_v3 }
 0x2d6   : > { %v922_v9 = vpop.f32.mrf.mxu2 }
 0x2d7   : > { %v929_v11 = vmul.f32 0.35355338, %v922_v9  ;;  %v895_v12 = vpop.f32.mrf.mxu1 }
 0x2d8   : > { %v927_v33 = vmul.f32 0.35355338, %v895_v12 }
 0x2d9   : > { %v2710_v13 = vadd.f32 %v2702_v8, %v929_v11 }
 0x2da   : > { %v2713_v14 = vadd.f32 %v2707_v10, %v927_v33 }
 0x2db   : > { %v948_v15 = vsel %vm941_vm13, %v2710_v13, -inf }
 0x2dc   : > { %949 = vmax.xlane.f32.xlu2 %v948_v15  ;;  %v942_v34 = vsel %vm941_vm13, %v2713_v14, -inf }
 0x2dd   : > { %943 = vmax.xlane.f32.xlu1 %v942_v34 }
 0x2de   : > { %v924_v16 = vpop.f32.mrf.mxu2 }
 0x2df   : > { %v930_v17 = vmul.f32 0.35355338, %v924_v16  ;;  %v897_v19 = vpop.f32.mrf.mxu1 }
 0x2e0   : > { %v928_v20 = vmul.f32 0.35355338, %v897_v19 }
 0x2e1   : > { %v2720_v21 = vadd.f32 %v2702_v8, %v930_v17 }
 0x2e2   : > { %v2723_v22 = vadd.f32 %v2707_v10, %v928_v20 }
 0x2e3   : > { %v951_v25 = vsel %vm941_vm13, %v2720_v21, -inf }
 0x2e4   : > { %v945_v26 = vsel %vm941_vm13, %v2723_v22, -inf }
 0x2e5   : > { %952 = vmax.xlane.f32.xlu1 %v951_v25  ;;  %946 = vmax.xlane.f32.xlu0 %v945_v26 }
 0x2e7   : > { %v1059_v27 = vpop.f32.mrf.mxu1 }
 0x2e8   : > { %v1088_v28 = vmul.f32 0.35355338, %v1059_v27 }
 0x2ea   : > { %v2730_v29 = vadd.f32 %v2707_v10, %v1088_v28 }
 0x2ec   : > { %v1096_v30 = vsel %vm941_vm13, %v2730_v29, -inf }
 0x2ed   : > { %1097 = vmax.xlane.f32.xlu0 %v1096_v30  ;;  %v1083_v31 = vpop.f32.mrf.mxu2 }
 0x2ee   : > { %v1090_v32 = vmul.f32 0.35355338, %v1083_v31 }
 0x2ef   : > { %v1061_v35 = vpop.f32.mrf.mxu1 }
 0x2f0   : > { %v1089_v36 = vmul.f32 0.35355338, %v1061_v35  ;;  %v2735_v37 = vadd.f32 %v2702_v8, %v1090_v32 }
 0x2f2   : > { %v2738_v38 = vadd.f32 %v2707_v10, %v1089_v36  ;;  %v1102_v41 = vsel %vm941_vm13, %v2735_v37, -inf }
 0x2f4   : > { %v1099_v40 = vsel %vm941_vm13, %v2738_v38, -inf }
 0x2f5   : > { %1100 = vmax.xlane.f32.xlu2 %v1099_v40  ;;  %1103 = vmax.xlane.f32.xlu0 %v1102_v41  ;;  %v1085_v42 = vpop.f32.mrf.mxu2 }
 0x2f6   : > { %v1091_v46 = vmul.f32 0.35355338, %v1085_v42 }
 0x2f7   : > { %v1213_v43 = vpop.f32.mrf.mxu1 }
 0x2f8   : > { %v1242_v44 = vmul.f32 0.35355338, %v1213_v43  ;;  %v2755_v53 = vadd.f32 %v2702_v8, %v1091_v46 }
 0x2fa   : > { %v2745_v45 = vadd.f32 %v2707_v10, %v1242_v44  ;;  %v1105_v55 = vsel %vm941_vm13, %v2755_v53, -inf }
 0x2fc   : > { %v1250_v47 = vsel %vm941_vm13, %v2745_v45, -inf }
 0x2fd   : > { %1251 = vmax.xlane.f32.xlu2 %v1250_v47  ;;  %v1237_v49 = vpop.f32.mrf.mxu2 }
 0x2fe   : > { %v1244_v50 = vmul.f32 0.35355338, %v1237_v49  ;;  %1303 = vrot.lane.b32.xlu1 %v2659_v39, %s2400_s21 }
 0x2ff   : > { %v1215_v51 = vpop.f32.mrf.mxu1 }
 0x300   : > { %v2752_v52 = vadd.f32 %v2702_v8, %v1244_v50  ;;  %v1243_v7 = vmul.f32 0.35355338, %v1215_v51 }
 0x302   : > { %v1256_v54 = vsel %vm941_vm13, %v2752_v52, -inf  ;;  %v2782_v9 = vadd.f32 %v2707_v10, %v1243_v7 }
 0x303   : > { %1257 = vmax.xlane.f32.xlu0 %v1256_v54 }
 0x304   : > { %v1253_v12 = vsel %vm941_vm13, %v2782_v9, -inf }
 0x305   : > { %1106 = vmax.xlane.f32.xlu2 %v1105_v55  ;;  %v1239_v56 = vpop.f32.mrf.mxu2 }
 0x306   : > { %v1245_v57 = vmul.f32 0.35355338, %v1239_v56 }
 0x307   : > { %v1367_v23 = vpop.f32.mrf.mxu1 }
 0x308   : > { %v2762_v24 = vadd.f32 %v2702_v8, %v1245_v57  ;;  %v1396_v11 = vmul.f32 0.35355338, %v1367_v23 }
 0x30a   : > { %v1259_v58 = vsel %vm941_vm13, %v2762_v24, -inf }
 0x30d   : > { %1260 = vmax.xlane.f32.xlu2 %v1259_v58 }
 0x30e   : > { %v1391_v59 = vpop.f32.mrf.mxu2 }
 0x30f   : > { %v1369_v60 = vpop.f32.mrf.mxu1  ;;  %v1398_v63 = vmul.f32 0.35355338, %v1391_v59 }
 0x310   : > { %v1397_v61 = vmul.f32 0.35355338, %v1369_v60 }
 0x311   : > { %v2772_v3 = vadd.f32 %v2702_v8, %v1398_v63 }
 0x312   : > { %v2767_v62 = vadd.f32 %v2707_v10, %v1397_v61 }
 0x313   : > { %v1410_v6 = vsel %vm941_vm13, %v2772_v3, -inf }
 0x314   : > { %v1407_v0 = vsel %vm941_vm13, %v2767_v62, -inf }
 0x315   : > { %1408 = vmax.xlane.f32.xlu0 %v1407_v0 }
 0x316   : > { %v1393_v1 = vpop.f32.mrf.mxu2 }
 0x317   : > { %v1399_v2 = vmul.f32 0.35355338, %v1393_v1 }
 0x319   : > { %v2775_v4 = vadd.f32 %v2702_v8, %v1399_v2  ;;  %v2787_v8 = vadd.f32 %v2707_v10, %v1396_v11 }
 0x31b   : > { %v1413_v5 = vsel %vm941_vm13, %v2775_v4, -inf  ;;  %v1404_v33 = vsel %vm941_vm13, %v2787_v8, -inf }
 0x31c   : > { %1414 = vmax.xlane.f32.xlu2 %v1413_v5 }
 0x31d   : > { %1411 = vmax.xlane.f32.xlu0 %v1410_v6 }
 0x328   : > { %1254 = vmax.xlane.f32.xlu1 %v1253_v12 }
 0x330   : > { %1405 = vmax.xlane.f32.xlu1 %v1404_v33 }
 0x34f   : > { %v950_v20 = vpop.xlane.xlu2 %949 }
 0x350   : > { %v944_v15 = vpop.xlane.xlu1 %943  ;;  %v956_v30 = vsub.f32 %v2710_v13, %v950_v20 }
 0x351   : > { %v954_v34 = vsub.f32 %v2713_v14, %v944_v15 }
 0x352   : > { %v962_v14 = vmul.f32 1.442695, %v956_v30 }
 0x353   : > { %v958_v16 = vmul.f32 1.442695, %v954_v34 }
 0x355   : > { %2290 = vpow2.f32 %v958_v16 }
 0x358   : > { %v953_v17 = vpop.xlane.xlu1 %952  ;;  %v947_v19 = vpop.xlane.xlu0 %946 }
 0x359   : > { %v957_v25 = vsub.f32 %v2720_v21, %v953_v17  ;;  %v955_v26 = vsub.f32 %v2723_v22, %v947_v19 }
 0x35b   : > { %v2794_v27 = vpop.eup %2290  ;;  %v964_v10 = vmul.f32 1.442695, %v957_v25  ;;  %v960_v28 = vmul.f32 1.442695, %v955_v26 }
 0x35c   : > { %v966_v31 = vsel %vm941_vm13, %v2794_v27, 0.0 }
 0x35d   : > { %2292 = vpow2.f32 %v964_v10  ;;  %967 = vadd.xlane.f32.xlu0 %v966_v31 }
 0x35e   : > { %2294 = vpow2.f32 %v960_v28 }
 0x35f   : > { %2296 = vpow2.f32 %v962_v14 }
 0x360   : > { %v1098_v32 = vpop.xlane.xlu0 %1097 }
 0x361   : > { %v1108_v35 = vsub.f32 %v2730_v29, %v1098_v32 }
 0x363   : > { %v2800_v36 = vpop.eup %2292  ;;  %v1112_v21 = vmul.f32 1.442695, %v1108_v35 }
 0x364   : > { %v2802_v22 = vpop.eup %2294  ;;  %v975_v40 = vsel %vm941_vm13, %v2800_v36, 0.0 }
 0x365   : > { %2298 = vpow2.f32 %v1112_v21  ;;  %976 = vadd.xlane.f32.xlu1 %v975_v40  ;;  %v969_v13 = vsel %vm941_vm13, %v2802_v22, 0.0  ;;  %v2809_v43 = vpop.eup %2296 }
 0x366   : > { %970 = vadd.xlane.f32.xlu2 %v969_v13  ;;  %v972_v47 = vsel %vm941_vm13, %v2809_v43, 0.0 }
 0x368   : > { %v1101_v41 = vpop.xlane.xlu2 %1100  ;;  %v1104_v49 = vpop.xlane.xlu0 %1103 }
 0x369   : > { %v1109_v42 = vsub.f32 %v2738_v38, %v1101_v41  ;;  %v1110_v38 = vsub.f32 %v2735_v37, %v1104_v49 }
 0x36b   : > { %v2811_v29 = vpop.eup %2298  ;;  %v1114_v44 = vmul.f32 1.442695, %v1109_v42  ;;  %v1116_v57 = vmul.f32 1.442695, %v1110_v38 }
 0x36c   : > { %v1120_v46 = vsel %vm941_vm13, %v2811_v29, 0.0 }
 0x36d   : > { %2300 = vpow2.f32 %v1114_v44  ;;  %1121 = vadd.xlane.f32.xlu0 %v1120_v46 }
 0x36e   : > { %973 = vadd.xlane.f32.xlu2 %v972_v47 }
 0x370   : > { %v1252_v50 = vpop.xlane.xlu2 %1251  ;;  %v2835_v60 = vpop.permute.xlu1 %1303 }
 0x371   : > { %v1262_v51 = vsub.f32 %v2745_v45, %v1252_v50 }
 0x373   : > { %v2818_v54 = vpop.eup %2300  ;;  %v1266_v55 = vmul.f32 1.442695, %v1262_v51 }
 0x374   : > { %v1123_v56 = vsel %vm941_vm13, %v2818_v54, 0.0 }
 0x375   : > { %2302 = vpow2.f32 %v1266_v55 }
 0x376   : > { %1124 = vadd.xlane.f32.xlu2 %v1123_v56  ;;  %2304 = vpow2.f32 %v1116_v57  ;;  %v1258_v63 = vpop.xlane.xlu0 %1257 }
 0x378   : > { %v1107_v59 = vpop.xlane.xlu2 %1106 }
 0x379   : > { %v1111_v5 = vsub.f32 %v2755_v53, %v1107_v59 }
 0x37b   : > { %v2823_v23 = vpop.eup %2302  ;;  %v1118_v11 = vmul.f32 1.442695, %v1111_v5 }
 0x37c   : > { %v1274_v58 = vsel %vm941_vm13, %v2823_v23, 0.0  ;;  %v2829_v45 = vpop.eup %2304 }
 0x37d   : > { %1275 = vadd.xlane.f32.xlu0 %v1274_v58  ;;  %v1126_v37 = vsel %vm941_vm13, %v2829_v45, 0.0 }
 0x37e   : > { %1174 = vrot.lane.b32.xlu1 %v2663_v48, %s2397_s22  ;;  %s2404_s22 = smov 24  }
 0x380   : > { %v1261_v61 = vpop.xlane.xlu2 %1260 }
 0x381   : > { %v1265_v26 = vsub.f32 %v2762_v24, %v1261_v61 }
 0x383   : > { %v1272_v28 = vmul.f32 1.442695, %v1265_v26 }
 0x385   : > { %1127 = vadd.xlane.f32.xlu0 %v1126_v37 }
 0x386   : > { %1457 = vrot.lane.b32.xlu1 %v2659_v39, %s2401_s20 }
 0x388   : > { %v1409_v33 = vpop.xlane.xlu0 %1408 }
 0x389   : > { %v1417_v16 = vsub.f32 %v2767_v62, %v1409_v33 }
 0x38f   : > { %v1415_v0 = vpop.xlane.xlu2 %1414 }
 0x390   : > { %v1419_v6 = vsub.f32 %v2775_v4, %v1415_v0  ;;  %v1422_v4 = vmul.f32 1.442695, %v1417_v16  ;;  %v1412_v30 = vpop.xlane.xlu0 %1411 }
 0x391   : > { %v1418_v24 = vsub.f32 %v2772_v3, %v1412_v30 }
 0x392   : > { %v1426_v12 = vmul.f32 1.442695, %v1419_v6 }
 0x393   : > { %v1424_v21 = vmul.f32 1.442695, %v1418_v24 }
 0x39b   : > { %v1255_v1 = vpop.xlane.xlu1 %1254 }
 0x39c   : > { %v1263_v2 = vsub.f32 %v2782_v9, %v1255_v1  ;;  %v1264_v9 = vsub.f32 %v2752_v52, %v1258_v63 }
 0x39e   : > { %v1268_v7 = vmul.f32 1.442695, %v1263_v2  ;;  %v1270_v20 = vmul.f32 1.442695, %v1264_v9 }
 0x3a0   : > { %2306 = vpow2.f32 %v1268_v7 }
 0x3a1   : > { %2308 = vpow2.f32 %v1118_v11 }
 0x3a2   : > { %2310 = vpow2.f32 %v1426_v12 }
 0x3a3   : > { %v1406_v15 = vpop.xlane.xlu1 %1405 }
 0x3a4   : > { %v1416_v39 = vsub.f32 %v2787_v8, %v1406_v15 }
 0x3a6   : > { %v2841_v34 = vpop.eup %2306  ;;  %v1420_v17 = vmul.f32 1.442695, %v1416_v39 }
 0x3a7   : > { %v1277_v53 = vsel %vm941_vm13, %v2841_v34, 0.0  ;;  %v2847_v19 = vpop.eup %2308 }
 0x3a8   : > { %2312 = vpow2.f32 %v1420_v17  ;;  %1278 = vadd.xlane.f32.xlu2 %v1277_v53  ;;  %v2849_v25 = vpop.eup %2310  ;;  %v1129_v62 = vsel %vm941_vm13, %v2847_v19, 0.0 }
 0x3a9   : > { %2314 = vpow2.f32 %v1422_v4  ;;  %v1437_v52 = vsel %vm941_vm13, %v2849_v25, 0.0 }
 0x3aa   : > { %2316 = vpow2.f32 %v1270_v20 }
 0x3ab   : > { %2318 = vpow2.f32 %v1272_v28 }
 0x3ac   : > { %2320 = vpow2.f32 %v1424_v21 }
 0x3ae   : > { %v2851_v8 = vpop.eup %2312 }
 0x3af   : > { %v1428_v10 = vsel %vm941_vm13, %v2851_v8, 0.0  ;;  %v2860_v31 = vpop.eup %2314 }
 0x3b0   : > { %1438 = vadd.xlane.f32.xlu1 %v1437_v52  ;;  %1130 = vadd.xlane.f32.xlu2 %v1129_v62  ;;  %v2862_v14 = vpop.eup %2316  ;;  %v1431_v32 = vsel %vm941_vm13, %v2860_v31, 0.0 }
 0x3b1   : > { %1429 = vadd.xlane.f32.xlu0 %v1428_v10  ;;  %v1280_v35 = vsel %vm941_vm13, %v2862_v14, 0.0  ;;  %v2869_v40 = vpop.eup %2318 }
 0x3b2   : > { %v1283_v13 = vsel %vm941_vm13, %v2869_v40, 0.0  ;;  %v2873_v41 = vpop.eup %2320 }
 0x3b3   : > { %v1434_v3 = vsel %vm941_vm13, %v2873_v41, 0.0 }
 0x3b8   : > { %1432 = vadd.xlane.f32.xlu2 %v1431_v32 }
 0x3b9   : > { %1281 = vadd.xlane.f32.xlu0 %v1280_v35 }
 0x3c0   : > { %1284 = vadd.xlane.f32.xlu2 %v1283_v13 }
 0x3c8   : > { %1435 = vadd.xlane.f32.xlu2 %v1434_v3 }
 0x3cd   : > { %1328 = vrot.lane.b32.xlu0 %v2663_v48, %s2400_s21 }
 0x3d0   : > { %v968_v42 = vpop.xlane.xlu0 %967 }
 0x3d1   : > { %2322 = vrcp.f32 %v968_v42 }
 0x3d7   : > { %v2323_v47 = vpop.eup %2322 }
 0x3d8   : > { %v977_v44 = vpop.xlane.xlu1 %976  ;;  %v982_v49 = vmul.f32 %v2323_v47, %v2794_v27 }
 0x3d9   : > { %v971_v46 = vpop.xlane.xlu2 %970 }
 0x3da   : > { %2324 = vrcp.f32 %v971_v46  ;;  %v986_v51 = vpack.c.bf16 %v982_v49, %v982_v49 }
 0x3db   : > { %2326 = vrcp.f32 %v977_v44 }
 0x3dc   : > { %v992_v58 = vunpack.c.l.b16 %v986_v51 }
 0x3e0   : > { %v2325_v50 = vpop.eup %2324  ;;  %1482 = vrot.lane.b32.xlu2 %v2663_v48, %s2401_s20  ;;  %v1122_v0 = vpop.xlane.xlu0 %1121 }
 0x3e1   : > { %v983_v38 = vmul.f32 %v2325_v50, %v2802_v22  ;;  %v974_v55 = vpop.xlane.xlu2 %973  ;;  %v2327_v56 = vpop.eup %2326 }
 0x3e2   : > { %2328 = vrcp.f32 %v974_v55  ;;  %v985_v59 = vmul.f32 %v2327_v56, %v2800_v36 }
 0x3e3   : > { %v987_v57 = vpack.c.bf16 %v983_v38, %v983_v38 }
 0x3e4   : > { %v989_v48 = vpack.c.bf16 %v985_v59, %v985_v59 }
 0x3e5   : > { %v993_v37 = vunpack.c.l.b16 %v987_v57 }
 0x3e6   : > { %v1018_v5 = vunpack.c.l.b16 %v989_v48 }
 0x3e7   : > { %v994_v61 = vpack.c.b16 %v993_v37, %v992_v58 }
 0x3e8   : > { %v2329_v63 = vpop.eup %2328 }
 0x3e9   : > { %v1125_v1 = vpop.xlane.xlu2 %1124  ;;  %2123 = vmatmul.msk.bf16.vlgmr.msrb.gmra.mxu0 %vm941_vm13, %v994_v61  ;;  %v984_v27 = vmul.f32 %v2329_v63, %v2809_v43 }
 0x3ea   : > { %2330 = vrcp.f32 %v1125_v1 }
 0x3eb   : > { %v988_v2 = vpack.c.bf16 %v984_v27, %v984_v27  ;;  %2332 = vrcp.f32 %v1122_v0 }
 0x3ed   : > { %v1017_v22 = vunpack.c.l.b16 %v988_v2 }
 0x3ef   : > { %v1019_v6 = vpack.c.b16 %v1018_v5, %v1017_v22 }
 0x3f0   : > { %v2331_v7 = vpop.eup %2330  ;;  %v1175_v11 = vpop.permute.xlu1 %1174 }
 0x3f1   : > { %2124 = vmatmul.msk.bf16.vlgmr.msra.gmra.mxu3 %vm941_vm13, %v1019_v6  ;;  %1187 = vmatpush.bf16.msra.mxu0 %v1175_v11  ;;  %v2333_v36 = vpop.eup %2332  ;;  %v1137_v12 = vmul.f32 %v2331_v7, %v2818_v54  ;;  %v1276_v53 = vpop.xlane.xlu0 %1275 }
 0x3f2   : > { %1316 = vmatpush.bf16.msra.mxu3 %v2835_v60  ;;  %v1136_v33 = vmul.f32 %v2333_v36, %v2811_v29  ;;  %2334 = vrcp.f32 %v1276_v53 }
 0x3f3   : > { %v1141_v43 = vpack.c.bf16 %v1137_v12, %v1137_v12 }
 0x3f4   : > { %v1140_v15 = vpack.c.bf16 %v1136_v33, %v1136_v33 }
 0x3f5   : > { %v1147_v39 = vunpack.c.l.b16 %v1141_v43 }
 0x3f6   : > { %v1146_v16 = vunpack.c.l.b16 %v1140_v15 }
 0x3f8   : > { %v1148_v17 = vpack.c.b16 %v1147_v39, %v1146_v16  ;;  %v1458_v9 = vpop.permute.xlu1 %1457  ;;  %v2335_v20 = vpop.eup %2334 }
 0x3f9   : > { %v1128_v26 = vpop.xlane.xlu0 %1127  ;;  %v1290_v60 = vmul.f32 %v2335_v20, %v2823_v23 }
 0x3fb   : > { %v1294_v29 = vpack.c.bf16 %v1290_v60, %v1290_v60 }
 0x3fd   : > { %v1300_v24 = vunpack.c.l.b16 %v1294_v29 }
 0x401   : > { %2127 = vmatmul.msk.bf16.vlgmr.msrb.gmra.mxu3 %vm941_vm13, %v1148_v17 }
 0x402   : > { %1470 = vmatpush.bf16.msrb.mxu3 %v1458_v9 }
 0x41b   : > { %v1279_v4 = vpop.xlane.xlu2 %1278 }
 0x41c   : > { %2336 = vrcp.f32 %v1279_v4 }
 0x41d   : > { %2338 = vrcp.f32 %v1128_v26 }
 0x422   : > { %v2337_v54 = vpop.eup %2336 }
 0x423   : > { %v1291_v52 = vmul.f32 %v2337_v54, %v2841_v34  ;;  %v1131_v62 = vpop.xlane.xlu2 %1130  ;;  %v2339_v28 = vpop.eup %2338 }
 0x424   : > { %v1430_v10 = vpop.xlane.xlu0 %1429  ;;  %2340 = vrcp.f32 %v1131_v62  ;;  %v1138_v35 = vmul.f32 %v2339_v28, %v2829_v45  ;;  %v1439_v27 = vpop.xlane.xlu1 %1438 }
 0x425   : > { %v1295_v30 = vpack.c.bf16 %v1291_v52, %v1291_v52  ;;  %2342 = vrcp.f32 %v1430_v10 }
 0x426   : > { %v1142_v42 = vpack.c.bf16 %v1138_v35, %v1138_v35 }
 0x427   : > { %v1301_v32 = vunpack.c.l.b16 %v1295_v30 }
 0x428   : > { %v1171_v49 = vunpack.c.l.b16 %v1142_v42 }
 0x429   : > { %v1302_v21 = vpack.c.b16 %v1301_v32, %v1300_v24 }
 0x42a   : > { %v2341_v13 = vpop.eup %2340 }
 0x42b   : > { %v1433_v3 = vpop.xlane.xlu2 %1432  ;;  %2131 = vmatmul.msk.bf16.vlgmr.msra.gmra.mxu3 %vm941_vm13, %v1302_v21  ;;  %v2343_v23 = vpop.eup %2342  ;;  %v1139_v44 = vmul.f32 %v2341_v13, %v2847_v19  ;;  %v2198_v13 = vld [vmem:[%s3092_s26 + $0x8] sm:$0xff] }
 0x42c   : > { %2344 = vrcp.f32 %v1433_v3  ;;  %v1282_v34 = vpop.xlane.xlu0 %1281  ;;  %v1444_v47 = vmul.f32 %v2343_v23, %v2851_v8  ;;  %1597 = vmatpush.bf16.msra.mxu1 %v2198_v13  ;;  %v2197_v3 = vld [vmem:[%s3092_s26] sm:$0xff] }
 0x42d   : > { %v1143_v46 = vpack.c.bf16 %v1139_v44, %v1139_v44  ;;  %2346 = vrcp.f32 %v1282_v34 }
 0x42e   : > { %v1448_v45 = vpack.c.bf16 %v1444_v47, %v1444_v47 }
 0x42f   : > { %v1172_v50 = vunpack.c.l.b16 %v1143_v46 }
 0x430   : > { %v1454_v19 = vunpack.c.l.b16 %v1448_v45  ;;  %1598 = vmatpush.bf16.msra.mxu1 %v2197_v3 }
 0x431   : > { %v1173_v38 = vpack.c.b16 %v1172_v50, %v1171_v49 }
 0x432   : > { %v2345_v51 = vpop.eup %2344 }
 0x433   : > { %v1445_v55 = vmul.f32 %v2345_v51, %v2860_v31  ;;  %v1285_v56 = vpop.xlane.xlu2 %1284  ;;  %v2347_v57 = vpop.eup %2346  ;;  %2128 = vmatmul.msk.bf16.vlgmr.msra.gmra.mxu0 %vm941_vm13, %v1173_v38 }
 0x434   : > { %2348 = vrcp.f32 %v1285_v56  ;;  %v1292_v59 = vmul.f32 %v2347_v57, %v2862_v14 }
 0x435   : > { %v1449_v58 = vpack.c.bf16 %v1445_v55, %v1445_v55 }
 0x436   : > { %v1296_v8 = vpack.c.bf16 %v1292_v59, %v1292_v59 }
 0x437   : > { %v1455_v37 = vunpack.c.l.b16 %v1449_v58 }
 0x438   : > { %v1325_v48 = vunpack.c.l.b16 %v1296_v8 }
 0x439   : > { %v1456_v61 = vpack.c.b16 %v1455_v37, %v1454_v19 }
 0x43a   : > { %v2349_v63 = vpop.eup %2348 }
 0x43b   : > { %v1293_v0 = vmul.f32 %v2349_v63, %v2869_v40  ;;  %v1436_v1 = vpop.xlane.xlu2 %1435  ;;  %2135 = vmatmul.msk.bf16.vlgmr.msrb.gmra.mxu3 %vm941_vm13, %v1456_v61 }
 0x43c   : > { %2350 = vrcp.f32 %v1436_v1 }
 0x43d   : > { %v1297_v31 = vpack.c.bf16 %v1293_v0, %v1293_v0  ;;  %2352 = vrcp.f32 %v1439_v27 }
 0x43f   : > { %v1326_v2 = vunpack.c.l.b16 %v1297_v31  ;;  %v1329_v22 = vpop.permute.xlu0 %1328 }
 0x440   : > { %1341 = vmatpush.bf16.msrb.mxu0 %v1329_v22 }
 0x441   : > { %v1327_v5 = vpack.c.b16 %v1326_v2, %v1325_v48 }
 0x442   : > { %v2351_v6 = vpop.eup %2350 }
 0x443   : > { %v1483_v7 = vpop.permute.xlu2 %1482  ;;  %2132 = vmatmul.msk.bf16.vlgmr.msrb.gmra.mxu0 %vm941_vm13, %v1327_v5  ;;  %v2353_v14 = vpop.eup %2352  ;;  %v1446_v40 = vmul.f32 %v2351_v6, %v2873_v41 }
 0x444   : > { %1495 = vmatpush.bf16.msra.mxu0 %v1483_v7  ;;  %v1447_v11 = vmul.f32 %v2353_v14, %v2849_v25 }
 0x445   : > { %v1450_v36 = vpack.c.bf16 %v1446_v40, %v1446_v40  ;;  %v2267_v40 = vld [vmem:[%s3093_s17] ss:$0 sm:$0xff] }
 0x446   : > { %v1451_v12 = vpack.c.bf16 %v1447_v11, %v1447_v11 }
 0x447   : > { %v1479_v33 = vunpack.c.l.b16 %v1450_v36 }
 0x448   : > { %v1480_v43 = vunpack.c.l.b16 %v1451_v12  ;;  %v2378_v12 = vld [vmem:[%s3068_s14] sm:$0xff] }
 0x44a   : > { %v1481_v15 = vpack.c.b16 %v1480_v43, %v1479_v33 }
 0x453   : > { %2136 = vmatmul.msk.bf16.vlgmr.msra.gmra.mxu0 %vm941_vm13, %v1481_v15 }
 0x466   : > { %v1010_v4 = vpop.f32.mrf.mxu0 }
 0x46e   : > { %v1012_v20 = vpop.f32.mrf.mxu0 }
 0x474   : > { %v1035_v39 = vpop.f32.mrf.mxu3 }
 0x47c   : > { %v1037_v16 = vpop.f32.mrf.mxu3 }
 0x484   : > { %v1164_v17 = vpop.f32.mrf.mxu3 }
 0x48c   : > { %v1166_v9 = vpop.f32.mrf.mxu3 }
 0x48d   : > { %v2232_v53 = vpack.i.bf16 %v1166_v9, %v1164_v17 }
 0x48f   : > { %2233 = vrot.lane.b32.xlu0 %v2232_v53, %s2402_s28 }
 0x4ae   : > { %v1318_v26 = vpop.f32.mrf.mxu3 }
 0x4b0   : > { %v1189_v41 = vpop.f32.mrf.mxu0 }
 0x4b6   : > { %v1320_v60 = vpop.f32.mrf.mxu3 }
 0x4b7   : > { %v2237_v25 = vpack.i.bf16 %v1320_v60, %v1318_v26 }
 0x4b8   : > { %v1191_v54 = vpop.f32.mrf.mxu0 }
 0x4b9   : > { %2238 = vrot.lane.b32.xlu0 %v2237_v25, %s2403_s24  ;;  %v2247_v52 = vpack.i.bf16 %v1191_v54, %v1189_v41  ;;  %v2381_v54 = vld [vmem:[%s3068_s14 + $0x18] sm:$0xff] }
 0x4be   : > { %v1472_v29 = vpop.f32.mrf.mxu3 }
 0x4c0   : > { %v1343_v62 = vpop.f32.mrf.mxu0 }
 0x4c1   : > { %2248 = vrot.lane.b32.xlu0 %v2247_v52, %s2402_s28 }
 0x4c6   : > { %v1474_v10 = vpop.f32.mrf.mxu3 }
 0x4c7   : > { %v2242_v28 = vpack.i.bf16 %v1474_v10, %v1472_v29 }
 0x4c8   : > { %v1345_v30 = vpop.f32.mrf.mxu0 }
 0x4c9   : > { %2243 = vrot.lane.b32.xlu2 %v2242_v28, %s2404_s22  ;;  %v2252_v24 = vpack.i.bf16 %v1345_v30, %v1343_v62 }
 0x4d0   : > { %v1497_v32 = vpop.f32.mrf.mxu0 }
 0x4d1   : > { %2253 = vrot.lane.b32.xlu2 %v2252_v24, %s2403_s24 }
 0x4d8   : > { %v1499_v35 = vpop.f32.mrf.mxu0 }
 0x4d9   : > { %v2257_v21 = vpack.i.bf16 %v1499_v35, %v1497_v32 }
 0x4db   : > { %2258 = vrot.lane.b32.xlu0 %v2257_v21, %s2404_s22 }
 0x501   : > { %v2234_v23 = vpop.permute.xlu0 %2233 }
 0x502   : > { %v2236_v42 = vunpack.i.h.bf16 %v2234_v23  ;;  %v2235_v44 = vunpack.i.l.bf16 %v2234_v23 }
 0x504   : > { %v1551_v50 = vsel %vm879_vm12, %v1012_v20, %v2236_v42  ;;  %v1550_v51 = vsel %vm879_vm12, %v1010_v4, %v2235_v44  ;;  %v2380_v20 = vld [vmem:[%s3068_s14 + $0x10] sm:$0xff] }
 0x523   : > { %v2244_v34 = vpop.permute.xlu2 %2243 }
 0x524   : > { %v2246_v38 = vunpack.i.h.bf16 %v2244_v34  ;;  %v2245_v45 = vunpack.i.l.bf16 %v2244_v34 }
 0x52b   : > { %v2239_v46 = vpop.permute.xlu0 %2238  ;;  %v2254_v63 = vpop.permute.xlu2 %2253 }
 0x52c   : > { %v2241_v47 = vunpack.i.h.bf16 %v2239_v46  ;;  %v2240_v49 = vunpack.i.l.bf16 %v2239_v46  ;;  %v2256_v1 = vunpack.i.h.bf16 %v2254_v63  ;;  %v2255_v27 = vunpack.i.l.bf16 %v2254_v63 }
 0x52e   : > { %v1554_v55 = vsel %vm941_vm13, %v1550_v51, %v2240_v49  ;;  %v1555_v56 = vsel %vm941_vm13, %v1551_v50, %v2241_v47 }
 0x52f   : > { %v1559_v57 = vsel %vm1558_vm14, %v1554_v55, %v2245_v45  ;;  %v1560_v58 = vsel %vm1558_vm14, %v1555_v56, %v2246_v38 }
 0x530   : > { %v1563_v19 = vpack.c.bf16 %v1560_v58, %v1559_v57 }
 0x532   : > { %2145 = vmatmul.msk.bf16.vlgmr.msra.gmra.mxu1 %vm647_vm1, %v1563_v19 }
 0x533   : > { %v2249_v37 = vpop.permute.xlu0 %2248 }
 0x534   : > { %v2251_v59 = vunpack.i.h.bf16 %v2249_v37  ;;  %v2250_v61 = vunpack.i.l.bf16 %v2249_v37 }
 0x536   : > { %v1553_v8 = vsel %vm879_vm12, %v1037_v16, %v2251_v59  ;;  %v1552_v0 = vsel %vm879_vm12, %v1035_v39, %v2250_v61  ;;  %v2379_v16 = vld [vmem:[%s3068_s14 + $0x8] sm:$0xff] }
 0x537   : > { %v1556_v22 = vsel %vm941_vm13, %v1552_v0, %v2255_v27  ;;  %v1557_v5 = vsel %vm941_vm13, %v1553_v8, %v2256_v1  ;;  %v2200_v0 = vld [vmem:[%s2528_s4 + $0x8] sm:$0xff] }
 0x538   : > { %1816 = vmatpush.bf16.msra.mxu2 %v2200_v0 }
 0x54d   : > { %v2259_v31 = vpop.permute.xlu0 %2258 }
 0x54e   : > { %v2261_v48 = vunpack.i.h.bf16 %v2259_v31  ;;  %v2260_v2 = vunpack.i.l.bf16 %v2259_v31 }
 0x550   : > { %v1561_v6 = vsel %vm1558_vm14, %v1556_v22, %v2260_v2  ;;  %v1562_v7 = vsel %vm1558_vm14, %v1557_v5, %v2261_v48  ;;  %v2199_v22 = vld [vmem:[%s2528_s4] sm:$0xff] }
 0x551   : > { %v1564_v14 = vpack.c.bf16 %v1562_v7, %v1561_v6  ;;  %1817 = vmatpush.bf16.msra.mxu2 %v2199_v22 }
 0x553   : > { %2146 = vmatmul.msk.bf16.gmra.mxu1 %vm647_vm1, %v1564_v14 }
 0x5af   : > { %v1600_v11 = vpop.f32.mrf.mxu1 }
 0x5b0   : > { %v1601_v36 = vadd.f32 %v2267_v40, %v1600_v11 }
 0x5b2   : > { %v2930_v33 = vadd.f32 %v2378_v12, %v1601_v36 }
 0x5b4   : > { %v1616_v43 = vsel %vm647_vm1, %v2930_v33, 0.0 }
 0x5b5   : > { %1617 = vadd.xlane.f32.xlu1 %v1616_v43 }
 0x5b7   : > { %v1602_v15 = vpop.f32.mrf.mxu1 }
 0x5b8   : > { %v1603_v39 = vadd.f32 %v2267_v40, %v1602_v15 }
 0x5ba   : > { %v2937_v17 = vadd.f32 %v2379_v16, %v1603_v39 }
 0x5bc   : > { %v1619_v9 = vsel %vm647_vm1, %v2937_v17, 0.0 }
 0x5bd   : > { %1620 = vadd.xlane.f32.xlu2 %v1619_v9 }
 0x5d0   : > { %v1605_v53 = vpop.f32.mrf.mxu1 }
 0x5d1   : > { %v1606_v4 = vadd.f32 %v2267_v40, %v1605_v53 }
 0x5d3   : > { %v2944_v26 = vadd.f32 %v2380_v20, %v1606_v4 }
 0x5d5   : > { %v1622_v41 = vsel %vm647_vm1, %v2944_v26, 0.0 }
 0x5d6   : > { %1623 = vadd.xlane.f32.xlu0 %v1622_v41 }
 0x5d8   : > { %v1607_v60 = vpop.f32.mrf.mxu1 }
 0x5d9   : > { %v1608_v25 = vadd.f32 %v2267_v40, %v1607_v60 }
 0x5db   : > { %v2951_v29 = vadd.f32 %v2381_v54, %v1608_v25 }
 0x5dd   : > { %v1625_v52 = vsel %vm647_vm1, %v2951_v29, 0.0 }
 0x5de   : > { %1626 = vadd.xlane.f32.xlu1 %v1625_v52 }
 0x628   : > { %v1618_v62 = vpop.xlane.xlu1 %1617 }
 0x629   : > { %v1628_v10 = vmul.f32 %v1618_v62, %v2584_v18 }
 0x62b   : > { %v2957_v28 = vsub.f32 %v2930_v33, %v1628_v10 }
 0x62d   : > { %v1636_v30 = vmul.f32 %v2957_v28, %v2957_v28 }
 0x62f   : > { %v1640_v24 = vsel %vm647_vm1, %v1636_v30, 0.0 }
 0x630   : > { %v1621_v32 = vpop.xlane.xlu2 %1620  ;;  %1641 = vadd.xlane.f32.xlu1 %v1640_v24  ;;  %v2990_v24 = vld [vmem:[%s605_s3] ss:$0 sm:$0xff] }
 0x631   : > { %v1629_v35 = vmul.f32 %v1621_v32, %v2584_v18 }
 0x633   : > { %v2964_v21 = vsub.f32 %v2937_v17, %v1629_v35 }
 0x635   : > { %v1637_v13 = vmul.f32 %v2964_v21, %v2964_v21 }
 0x637   : > { %v1643_v3 = vsel %vm647_vm1, %v1637_v13, 0.0 }
 0x638   : > { %1644 = vadd.xlane.f32.xlu1 %v1643_v3 }
 0x649   : > { %v1624_v23 = vpop.xlane.xlu0 %1623 }
 0x64a   : > { %v1630_v42 = vmul.f32 %v1624_v23, %v2584_v18 }
 0x64c   : > { %v2971_v44 = vsub.f32 %v2944_v26, %v1630_v42 }
 0x64e   : > { %v1638_v34 = vmul.f32 %v2971_v44, %v2971_v44 }
 0x650   : > { %v1646_v46 = vsel %vm647_vm1, %v1638_v34, 0.0 }
 0x651   : > { %1647 = vadd.xlane.f32.xlu1 %v1646_v46  ;;  %v1627_v47 = vpop.xlane.xlu1 %1626 }
 0x652   : > { %v1631_v49 = vmul.f32 %v1627_v47, %v2584_v18  ;;  %v1659_v47 = vmul.f32 %v2990_v24, %v2957_v28 }
 0x654   : > { %v2978_v50 = vsub.f32 %v2951_v29, %v1631_v49 }
 0x656   : > { %v1639_v51 = vmul.f32 %v2978_v50, %v2978_v50 }
 0x658   : > { %v1649_v38 = vsel %vm647_vm1, %v1639_v51, 0.0 }
 0x659   : > { %1650 = vadd.xlane.f32.xlu1 %v1649_v38  ;;  %v1660_v38 = vmul.f32 %v2990_v24, %v2964_v21 }
 0x6a3   : > { %v1642_v45 = vpop.xlane.xlu1 %1641 }
 0x6a4   : > { %v1652_v55 = vmul.f32 0.032258064, %v1642_v45 }
 0x6a6   : > { %2354 = vrsqrt.f32 %v1652_v55  ;;  %vm1670_vm15 = vcmp.eq.f32.partialorder %v1652_v55, inf  ;;  %v1673_v31 = vand.u32 2147483648, %v1652_v55  ;;  %vm1672_vm0 = vcmp.eq.f32.partialorder %v1652_v55, 0.0 }
 0x6ab   : > { %v1645_v56 = vpop.xlane.xlu1 %1644 }
 0x6ac   : > { %v2355_v57 = vpop.eup %2354  ;;  %v1653_v58 = vmul.f32 0.032258064, %v1645_v56 }
 0x6ad   : > { %v1664_v19 = vmul.f32 %v2355_v57, %v1652_v55 }
 0x6ae   : > { %2356 = vrsqrt.f32 %v1653_v58  ;;  %vm1682_vm2 = vcmp.eq.f32.partialorder %v1653_v58, inf  ;;  %v1685_v11 = vand.u32 2147483648, %v1653_v58  ;;  %vm1684_vm3 = vcmp.eq.f32.partialorder %v1653_v58, 0.0 }
 0x6af   : > { %v1665_v18 = vmul.f32 %v2355_v57, %v1664_v19 }
 0x6b1   : > { %v1666_v37 = vmul.f32 0.5, %v1665_v18 }
 0x6b3   : > { %v1667_v59 = vsub.f32 1.5, %v1666_v37 }
 0x6b4   : > { %v2357_v61 = vpop.eup %2356 }
 0x6b5   : > { %v1668_v63 = vmul.f32 %v2355_v57, %v1667_v59  ;;  %v1676_v8 = vmul.f32 %v2357_v61, %v1653_v58 }
 0x6b7   : > { %v1669_v1 = vmul.f32 %v1668_v63, %v1652_v55  ;;  %v1677_v27 = vmul.f32 %v2357_v61, %v1676_v8 }
 0x6b9   : > { %v1671_v48 = vsel %vm1670_vm15, %v1652_v55, %v1669_v1  ;;  %v1678_v2 = vmul.f32 0.5, %v1677_v27 }
 0x6ba   : > { %v1674_v5 = vsel %vm1672_vm0, %v1673_v31, %v1671_v48 }
 0x6bb   : > { %v1711_v6 = vadd.f32 1e-06, %v1674_v5  ;;  %v1679_v7 = vsub.f32 1.5, %v1678_v2 }
 0x6bd   : > { %2358 = vrcp.f32 %v1711_v6  ;;  %v1680_v14 = vmul.f32 %v2357_v61, %v1679_v7  ;;  %v1724_v60 = vand.u32 2147483647, %v1711_v6  ;;  %v1726_v25 = vand.u32 2147483648, %v1711_v6 }
 0x6be   : > { %vm1720_vm5 = vweird.f32 %v1711_v6 }
 0x6bf   : > { %v1681_v40 = vmul.f32 %v1680_v14, %v1653_v58  ;;  %vm1725_vm7 = vcmp.eq.f32.partialorder %v1724_v60, 8.507059e+37  ;;  %v1727_v13 = vor.u32 1.1754944e-38, %v1726_v25 }
 0x6c1   : > { %v1683_v36 = vsel %vm1682_vm2, %v1653_v58, %v1681_v40  ;;  %v3001_v58 = vld [vmem:[%s608_s25] ss:$0 sm:$0xff] }
 0x6c2   : > { %v1686_v12 = vsel %vm1684_vm3, %v1685_v11, %v1683_v36 }
 0x6c3   : > { %v2359_v43 = vpop.eup %2358  ;;  %v1712_v15 = vadd.f32 1e-06, %v1686_v12 }
 0x6c4   : > { %v1716_v39 = vmul.f32 %v2359_v43, %v1711_v6  ;;  %v1648_v16 = vpop.xlane.xlu1 %1647  ;;  %vm1721_vm4 = vweird.f32 %v2359_v43 }
 0x6c5   : > { %2360 = vrcp.f32 %v1712_v15  ;;  %v1654_v9 = vmul.f32 0.032258064, %v1648_v16  ;;  %vm1722_vm6 = vmor %vm1720_vm5, %vm1721_vm4  ;;  %v1741_v3 = vand.u32 2147483648, %v1712_v15  ;;  %v1739_v34 = vand.u32 2147483647, %v1712_v15 }
 0x6c6   : > { %v1717_v53 = vsub.f32 1.0, %v1716_v39  ;;  %vm1735_vm9 = vweird.f32 %v1712_v15 }
 0x6c7   : > { %2362 = vrsqrt.f32 %v1654_v9  ;;  %v1742_v45 = vor.u32 1.1754944e-38, %v1741_v3  ;;  %vm1740_vm11 = vcmp.eq.f32.partialorder %v1739_v34, 8.507059e+37  ;;  %vm1694_vm12 = vcmp.eq.f32.partialorder %v1654_v9, inf }
 0x6c8   : > { %v1718_v4 = vmul.f32 %v2359_v43, %v1717_v53  ;;  %v1697_v0 = vand.u32 2147483648, %v1654_v9  ;;  %vm1696_vm13 = vcmp.eq.f32.partialorder %v1654_v9, 0.0 }
 0x6ca   : > { %v1719_v41 = vadd.f32 %v2359_v43, %v1718_v4 }
 0x6cb   : > { %v2361_v20 = vpop.eup %2360 }
 0x6cc   : > { %v1731_v54 = vmul.f32 %v2361_v20, %v1712_v15  ;;  %v1651_v52 = vpop.xlane.xlu1 %1650  ;;  %v1723_v35 = vsel %vm1722_vm6, %v2359_v43, %v1719_v41  ;;  %vm1736_vm8 = vweird.f32 %v2361_v20 }
 0x6cd   : > { %v2363_v62 = vpop.eup %2362  ;;  %v1655_v10 = vmul.f32 0.032258064, %v1651_v52  ;;  %v1728_v46 = vsel %vm1725_vm7, %v1727_v13, %v1723_v35  ;;  %vm1737_vm10 = vmor %vm1735_vm9, %vm1736_vm8  ;;  %v1662_v35 = vmul.f32 %v2990_v24, %v2978_v50  ;;  %v2207_v50 = vld [vmem:[%s2538_s19 + $0x30] sm:$0xff] }
 0x6ce   : > { %v1732_v30 = vsub.f32 1.0, %v1731_v54  ;;  %v1688_v32 = vmul.f32 %v2363_v62, %v1654_v9  ;;  %v1729_v56 = vmul.f32 %v1728_v46, %v1659_v47  ;;  %v2208_v47 = vld [vmem:[%s2538_s19 + $0x38] sm:$0xff] }
 0x6cf   : > { %2364 = vrsqrt.f32 %v1655_v10  ;;  %vm1706_vm14 = vcmp.eq.f32.partialorder %v1655_v10, inf  ;;  %v1709_v7 = vand.u32 2147483648, %v1655_v10  ;;  %vm1708_vm15 = vcmp.eq.f32.partialorder %v1655_v10, 0.0  ;;  %1935 = vmatpush.bf16.msra.mxu3 %v2208_v47 }
 0x6d0   : > { %v1689_v23 = vmul.f32 %v2363_v62, %v1688_v32  ;;  %v1733_v42 = vmul.f32 %v2361_v20, %v1732_v30  ;;  %v1778_v21 = vadd.f32 %v3001_v58, %v1729_v56  ;;  %v2270_v56 = vld [vmem:[%s616_s6] ss:$0 sm:$0xff] }
 0x6d2   : > { %v1690_v49 = vmul.f32 0.5, %v1689_v23  ;;  %v1734_v51 = vadd.f32 %v2361_v20, %v1733_v42 }
 0x6d3   : > { %1936 = vmatpush.bf16.msra.mxu3 %v2207_v50 }
 0x6d4   : > { %v1691_v55 = vsub.f32 1.5, %v1690_v49  ;;  %v1738_v57 = vsel %vm1737_vm10, %v2361_v20, %v1734_v51  ;;  %v2205_v49 = vld [vmem:[%s2538_s19 + $0x20] sm:$0xff]  ;;  %v2204_v51 = vld [vmem:[%s2538_s19 + $0x18] sm:$0xff] }
 0x6d5   : > { %v2365_v19 = vpop.eup %2364  ;;  %v1743_v28 = vsel %vm1740_vm11, %v1742_v45, %v1738_v57  ;;  %v2202_v45 = vld [vmem:[%s2538_s19 + $0x8] sm:$0xff] }
 0x6d6   : > { %v1692_v18 = vmul.f32 %v2363_v62, %v1691_v55  ;;  %v1700_v37 = vmul.f32 %v2365_v19, %v1655_v10  ;;  %v1744_v59 = vmul.f32 %v1743_v28, %v1660_v38  ;;  %v2203_v38 = vld [vmem:[%s2538_s19 + $0x10] sm:$0xff]  ;;  %v2201_v55 = vld [vmem:[%s2538_s19] sm:$0xff] }
 0x6d8   : > { %v1693_v61 = vmul.f32 %v1692_v18, %v1654_v9  ;;  %v1701_v63 = vmul.f32 %v2365_v19, %v1700_v37  ;;  %v1779_v8 = vadd.f32 %v3001_v58, %v1744_v59 }
 0x6da   : > { %v1695_v1 = vsel %vm1694_vm12, %v1654_v9, %v1693_v61  ;;  %v1702_v27 = vmul.f32 0.5, %v1701_v63  ;;  %v1782_v31 = vpack.c.bf16 %v1779_v8, %v1778_v21 }
 0x6db   : > { %v1698_v48 = vsel %vm1696_vm13, %v1697_v0, %v1695_v1 }
 0x6dc   : > { %v1703_v2 = vsub.f32 1.5, %v1702_v27  ;;  %2155 = vmatmul.msk.bf16.vlgmr.msra.gmra.mxu2 %vm647_vm1, %v1782_v31  ;;  %v1713_v22 = vadd.f32 1e-06, %v1698_v48 }
 0x6de   : > { %v1704_v5 = vmul.f32 %v2365_v19, %v1703_v2  ;;  %2366 = vrcp.f32 %v1713_v22  ;;  %v1756_v9 = vand.u32 2147483648, %v1713_v22  ;;  %vm1750_vm2 = vweird.f32 %v1713_v22 }
 0x6df   : > { %v1754_v53 = vand.u32 2147483647, %v1713_v22 }
 0x6e0   : > { %v1705_v6 = vmul.f32 %v1704_v5, %v1655_v10  ;;  %v1757_v60 = vor.u32 1.1754944e-38, %v1756_v9 }
 0x6e1   : > { %vm1755_vm4 = vcmp.eq.f32.partialorder %v1754_v53, 8.507059e+37 }
 0x6e2   : > { %v1707_v14 = vsel %vm1706_vm14, %v1655_v10, %v1705_v6  ;;  %v1661_v10 = vmul.f32 %v2990_v24, %v2971_v44  ;;  %v2206_v24 = vld [vmem:[%s2538_s19 + $0x28] sm:$0xff] }
 0x6e3   : > { %v1710_v40 = vsel %vm1708_vm15, %v1709_v7, %v1707_v14  ;;  %1937 = vmatpush.bf16.msra.mxu3 %v2206_v24 }
 0x6e4   : > { %v2367_v11 = vpop.eup %2366  ;;  %v1714_v36 = vadd.f32 1e-06, %v1710_v40 }
 0x6e5   : > { %v1746_v12 = vmul.f32 %v2367_v11, %v1713_v22  ;;  %vm1751_vm0 = vweird.f32 %v2367_v11 }
 0x6e6   : > { %2368 = vrcp.f32 %v1714_v36  ;;  %vm1752_vm3 = vmor %vm1750_vm2, %vm1751_vm0  ;;  %v1771_v25 = vand.u32 2147483648, %v1714_v36  ;;  %v1769_v52 = vand.u32 2147483647, %v1714_v36  ;;  %vm1765_vm6 = vweird.f32 %v1714_v36 }
 0x6e7   : > { %v1747_v43 = vsub.f32 1.0, %v1746_v12  ;;  %1938 = vmatpush.bf16.msra.mxu3 %v2205_v49 }
 0x6e8   : > { %v1772_v32 = vor.u32 1.1754944e-38, %v1771_v25  ;;  %vm1770_vm8 = vcmp.eq.f32.partialorder %v1769_v52, 8.507059e+37 }
 0x6e9   : > { %v1748_v15 = vmul.f32 %v2367_v11, %v1747_v43 }
 0x6eb   : > { %v1749_v39 = vadd.f32 %v2367_v11, %v1748_v15  ;;  %1939 = vmatpush.bf16.msra.mxu3 %v2204_v51 }
 0x6ec   : > { %v2369_v16 = vpop.eup %2368 }
 0x6ed   : > { %v1761_v4 = vmul.f32 %v2369_v16, %v1714_v36  ;;  %v1753_v20 = vsel %vm1752_vm3, %v2367_v11, %v1749_v39  ;;  %vm1766_vm5 = vweird.f32 %v2369_v16 }
 0x6ee   : > { %v1758_v62 = vsel %vm1755_vm4, %v1757_v60, %v1753_v20  ;;  %vm1767_vm7 = vmor %vm1765_vm6, %vm1766_vm5 }
 0x6ef   : > { %v1762_v41 = vsub.f32 1.0, %v1761_v4  ;;  %v1759_v13 = vmul.f32 %v1758_v62, %v1661_v10  ;;  %1940 = vmatpush.bf16.msra.mxu3 %v2203_v38 }
 0x6f1   : > { %v1763_v54 = vmul.f32 %v2369_v16, %v1762_v41  ;;  %v1780_v34 = vadd.f32 %v3001_v58, %v1759_v13 }
 0x6f3   : > { %v1764_v30 = vadd.f32 %v2369_v16, %v1763_v54  ;;  %1941 = vmatpush.bf16.msra.mxu3 %v2202_v45 }
 0x6f5   : > { %v1768_v3 = vsel %vm1767_vm7, %v2369_v16, %v1764_v30 }
 0x6f6   : > { %v1773_v23 = vsel %vm1770_vm8, %v1772_v32, %v1768_v3 }
 0x6f7   : > { %v1774_v42 = vmul.f32 %v1773_v23, %v1662_v35  ;;  %1942 = vmatpush.bf16.msra.mxu3 %v2201_v55  ;;  %v2271_v23 = vld [vmem:[%s624_s23] ss:$0 sm:$0xff] }
 0x6f9   : > { %v1781_v44 = vadd.f32 %v3001_v58, %v1774_v42 }
 0x6fb   : > { %v1783_v46 = vpack.c.bf16 %v1781_v44, %v1780_v34 }
 0x6fd   : > { %2156 = vmatmul.msk.bf16.gmra.mxu2 %vm647_vm1, %v1783_v46 }
 0x75f   : > { %v1819_v57 = vpop.f32.mrf.mxu2 }
 0x760   : > { %v1820_v58 = vadd.f32 %v2270_v56, %v1819_v57 }
 0x762   : > { %v1833_v19 = vmul.f32 0.044715, %v1820_v58  ;;  %v1829_v22 = vmul.f32 0.5, %v1820_v58 }
 0x764   : > { %v1837_v28 = vmul.f32 %v1833_v19, %v1820_v58 }
 0x766   : > { %v1841_v18 = vmul.f32 %v1837_v28, %v1820_v58 }
 0x767   : > { %v1821_v37 = vpop.f32.mrf.mxu2 }
 0x768   : > { %v1845_v59 = vadd.f32 %v1841_v18, %v1820_v58  ;;  %v1822_v61 = vadd.f32 %v2270_v56, %v1821_v37 }
 0x76a   : > { %v1834_v63 = vmul.f32 0.044715, %v1822_v61  ;;  %v1849_v21 = vmul.f32 0.7978846, %v1845_v59  ;;  %v1830_v5 = vmul.f32 0.5, %v1822_v61 }
 0x76c   : > { %v1838_v8 = vmul.f32 %v1834_v63, %v1822_v61  ;;  %2370 = vtanh.f32 %v1849_v21 }
 0x76e   : > { %v1842_v0 = vmul.f32 %v1838_v8, %v1822_v61 }
 0x770   : > { %v1846_v1 = vadd.f32 %v1842_v0, %v1822_v61 }
 0x772   : > { %v1850_v27 = vmul.f32 0.7978846, %v1846_v1  ;;  %v2371_v31 = vpop.eup %2370 }
 0x773   : > { %v1857_v48 = vadd.f32 1.0, %v2371_v31 }
 0x774   : > { %2372 = vtanh.f32 %v1850_v27 }
 0x775   : > { %v1861_v7 = vmul.f32 %v1857_v48, %v1829_v22 }
 0x77a   : > { %v2373_v2 = vpop.eup %2372 }
 0x77b   : > { %v1858_v6 = vadd.f32 1.0, %v2373_v2 }
 0x77d   : > { %v1862_v14 = vmul.f32 %v1858_v6, %v1830_v5 }
 0x77f   : > { %v1865_v40 = vpack.c.bf16 %v1862_v14, %v1861_v7 }
 0x780   : > { %v1824_v11 = vpop.f32.mrf.mxu2 }
 0x781   : > { %v1825_v36 = vadd.f32 %v2270_v56, %v1824_v11  ;;  %1943 = vmatmul.bf16.vlgmr.msra.gmra.mxu3 %v1865_v40 }
 0x783   : > { %v1835_v12 = vmul.f32 0.044715, %v1825_v36  ;;  %v1831_v10 = vmul.f32 0.5, %v1825_v36 }
 0x785   : > { %v1839_v43 = vmul.f32 %v1835_v12, %v1825_v36 }
 0x787   : > { %v1843_v15 = vmul.f32 %v1839_v43, %v1825_v36 }
 0x788   : > { %v1826_v39 = vpop.f32.mrf.mxu2 }
 0x789   : > { %v1827_v16 = vadd.f32 %v2270_v56, %v1826_v39  ;;  %v1847_v9 = vadd.f32 %v1843_v15, %v1825_v36 }
 0x78b   : > { %v1836_v53 = vmul.f32 0.044715, %v1827_v16  ;;  %v1851_v20 = vmul.f32 0.7978846, %v1847_v9  ;;  %v1832_v30 = vmul.f32 0.5, %v1827_v16 }
 0x78d   : > { %v1840_v4 = vmul.f32 %v1836_v53, %v1827_v16  ;;  %2374 = vtanh.f32 %v1851_v20 }
 0x78f   : > { %v1844_v41 = vmul.f32 %v1840_v4, %v1827_v16 }
 0x791   : > { %v1848_v60 = vadd.f32 %v1844_v41, %v1827_v16 }
 0x793   : > { %v1852_v25 = vmul.f32 0.7978846, %v1848_v60  ;;  %v2375_v54 = vpop.eup %2374 }
 0x794   : > { %v1859_v52 = vadd.f32 1.0, %v2375_v54 }
 0x795   : > { %2376 = vtanh.f32 %v1852_v25 }
 0x796   : > { %v1863_v35 = vmul.f32 %v1859_v52, %v1831_v10 }
 0x79b   : > { %v2377_v62 = vpop.eup %2376 }
 0x79c   : > { %v1860_v32 = vadd.f32 1.0, %v2377_v62 }
 0x79e   : > { %v1864_v13 = vmul.f32 %v1860_v32, %v1832_v30 }
 0x7a0   : > { %v1866_v3 = vpack.c.bf16 %v1864_v13, %v1863_v35 }
 0x7a2   : > { %1948 = vmatmul.bf16.gmra.mxu3 %v1866_v3 }
 0x804   : > { %v1944_v42 = vpop.f32.mrf.mxu3 }
 0x805   : > { %v1945_v34 = vadd.f32 %v2271_v23, %v1944_v42 }
 0x807   : > { %v1954_v44 = vadd.f32 %v1945_v34, %v2930_v33 }
 0x809   : > { %1958 = vst.msk [vmem:[%s3068_s14] sm:$0xff] %vm647_vm1, %v1954_v44 }
 0x80c   : > { %v1946_v46 = vpop.f32.mrf.mxu3 }
 0x80d   : > { %v1947_v47 = vadd.f32 %v2271_v23, %v1946_v46 }
 0x80f   : > { %v1955_v50 = vadd.f32 %v1947_v47, %v2937_v17 }
 0x811   : > { %1959 = vst.msk [vmem:[%s3068_s14 + $0x8] sm:$0xff] %vm647_vm1, %v1955_v50 }
 0x825   : > { %v1949_v24 = vpop.f32.mrf.mxu3 }
 0x826   : > { %v1950_v49 = vadd.f32 %v2271_v23, %v1949_v24 }
 0x828   : > { %v1956_v51 = vadd.f32 %v1950_v49, %v2944_v26 }
 0x82a   : > { %1960 = vst.msk [vmem:[%s3068_s14 + $0x10] sm:$0xff] %vm647_vm1, %v1956_v51 }
 0x82d   : > { %v1951_v33 = vpop.f32.mrf.mxu3 }
 0x82e   : > { %v1952_v38 = vadd.f32 %v2271_v23, %v1951_v33 }
 0x830   : > { %v1957_v45 = vadd.f32 %v1952_v38, %v2951_v29 }
 0x832   : > { %1961 = vst.msk [vmem:[%s3068_s14 + $0x18] sm:$0xff] %vm647_vm1, %v1957_v45 }
 0x833 PF: > { %s3094_s28 = sld [smem:[#allocation2_spill]] }
 0x839   : > { %s24_s29 = sadd.s32 1, %s3094_s28  }
 0x83a   : > { %p21_p5 = scmp.ge.s32.totalorder %s24_s29, 4  }
 0x83c   :  { %23 = sbr.rel (!%p21_p5) target bundleno = 5 (0x5), region = 139 }

</bundles_post_ra>
